<compile_context>
chip_gen: v7x
topology: tpu7x:2x2x1
jax: 0.10.0
libtpu: 0.0.40
codegen_flags: <defaults>
</compile_context>

<pallas_src>
import jax
import jax.numpy as jnp
from jax.experimental import pallas as pl
from jax.experimental.pallas import tpu as pltpu

# ----- small, module-consistent sizes (TPU-tile friendly) -----
N = 8            # batch
T = 8            # sequence_length
I = 16           # input_size
H = 32           # hidden_size  (4*H = 128 = one lane tile)
NUM_CLASSES = 10
NUM_LAYERS = 2   # fixed: both layers wavefronted inside the kernel


def lstm2_fc_kernel(x_ref, wx0_ref, b0_ref, wblk_ref, b1_ref, wfc_ref, bfc_ref,
                    out_ref, xg0_buf, h1_buf):
    """Wavefront-pipelined 2-layer LSTM + fused FC head, unrolled over T.

    Gate layout inside the kernel is the PERMUTED order [i, f, o, g] (host
    side permutes the weight/bias columns).  x_ref is time-major-flattened:
    row index = t*N + n.
    """
    f32 = jnp.float32

    # ---- layer 0: batched input projection for all T steps (+bias, once),
    # staged in VMEM scratch so it does not occupy vregs during the loop ----
    xg0_buf[...] = jnp.dot(x_ref[...], wx0_ref[...],
                           preferred_element_type=f32) + b0_ref[...]

    w_blk = wblk_ref[...]                                   # (2H, 8H), invariant
    b1 = jnp.broadcast_to(b1_ref[...], (N, 4 * H))          # hoisted broadcast

    def act(g):
        # gate order [i, f, o, g]: one sigmoid pass + one tanh pass per vector
        sg = jax.nn.sigmoid(g[:, :3 * H])
        tg = jnp.tanh(g[:, 3 * H:])
        return sg[:, :H], sg[:, H:2 * H], sg[:, 2 * H:3 * H], tg

    # ---- wavefront step 0: layer-0 step 0 only (h0_{-1}=0 -> no matmul) ----
    i0, f0, o0, g0 = act(xg0_buf[0:N, :])
    c0 = i0 * g0
    h0 = o0 * jnp.tanh(c0)
    c1 = jnp.zeros((N, H), f32)
    h1 = jnp.zeros((N, H), f32)

    # ---- wavefront steps s = 1..T: one (N,2H)@(2H,8H) MXU push gives
    #   cols 0:4H  -> layer-0 step s    recurrent term  (h0_{s-1} @ Wh0)
    #   cols 4H:8H -> layer-1 step s-1  pre-activation  (h0_{s-1}@Wx1 + h1_{s-2}@Wh1)
    for s in range(1, T + 1):                               # statically unrolled
        lhs = jnp.concatenate([h0, h1], axis=1)             # (N, 2H)
        blk = jnp.dot(lhs, w_blk, preferred_element_type=f32)   # (N, 8H)

        # layer-1, time step s-1
        i1, f1, o1, g1 = act(blk[:, 4 * H:] + b1)
        c1 = f1 * c1 + i1 * g1
        h1 = o1 * jnp.tanh(c1)
        h1_buf[:, (s - 1) * H:s * H] = h1                   # off the dep chain

        # layer-0, time step s (does not exist at s == T)
        if s < T:
            i0, f0, o0, g0 = act(blk[:, :4 * H]
                                 + xg0_buf[s * N:(s + 1) * N, :])
            c0 = f0 * c0 + i0 * g0
            h0 = o0 * jnp.tanh(c0)

    # ---- deferred FC head: single (N, T*H) @ (T*H, C) matmul ----
    logits = jnp.dot(h1_buf[...], wfc_ref[...],
                     preferred_element_type=f32) + bfc_ref[...]
    out_ref[...] = logits.astype(out_ref.dtype)


def _cost_estimate():
    flops = (2 * T * N * I * 4 * H                # layer-0 batched input proj
             + 2 * T * N * (2 * H) * (8 * H)      # T block-packed wavefront matmuls
             + 2 * N * (T * H) * NUM_CLASSES)     # deferred FC head
    transcendentals = NUM_LAYERS * T * 5 * N * H  # sigmoid/tanh passes (elem count)
    bytes_accessed = 4 * (T * N * I + I * 4 * H + (2 * H) * (8 * H)
                          + 2 * 4 * H + T * H * NUM_CLASSES + NUM_CLASSES
                          + N * NUM_CLASSES)
    return pl.CostEstimate(flops=flops, transcendentals=transcendentals,
                           bytes_accessed=bytes_accessed)


def _perm_gates(w):
    """Permute PyTorch gate order [i, f, g, o] -> kernel order [i, f, o, g]."""
    return jnp.concatenate([w[..., :2 * H], w[..., 3 * H:4 * H],
                            w[..., 2 * H:3 * H]], axis=-1)


@jax.jit
def rnn_lstm_forward(x, params):
    """x: (N, T, I) float32 -> logits (N, NUM_CLASSES)."""
    wx0, wh0, b0, wx1, wh1, b1, w_fc, b_fc = params

    # host-side (XLA) packing: gate permutation + block recurrent weight
    wx0_p = _perm_gates(wx0)
    b0_p = _perm_gates(b0)
    b1_p = _perm_gates(b1)
    w_blk = jnp.concatenate(
        [jnp.concatenate([_perm_gates(wh0), _perm_gates(wx1)], axis=1),
         jnp.concatenate([jnp.zeros((H, 4 * H), jnp.float32),
                          _perm_gates(wh1)], axis=1)],
        axis=0)                                              # (2H, 8H) = (64, 256)

    # time-major + flatten: row index = t*N + n (tiny relayout, keeps every
    # in-kernel access a tile-aligned 2D slice)
    x_tm = jnp.transpose(x, (1, 0, 2)).reshape(T * N, I)

    vmem = pltpu.MemorySpace.VMEM
    return pl.pallas_call(
        lstm2_fc_kernel,
        out_shape=jax.ShapeDtypeStruct((N, NUM_CLASSES), jnp.float32),
        in_specs=[pl.BlockSpec(memory_space=vmem)] * 7,
        out_specs=pl.BlockSpec(memory_space=vmem),
        scratch_shapes=[pltpu.VMEM((T * N, 4 * H), jnp.float32),   # xg0 stage
                        pltpu.VMEM((N, T * H), jnp.float32)],      # h1 stage
        cost_estimate=_cost_estimate(),
    )(x_tm, wx0_p, b0_p, w_blk, b1_p, w_fc, b_fc)


def make_params(key):
    """Deterministic synthetic parameters with PyTorch LSTM shapes/order.

    PyTorch stores W_ih (4H, in), W_hh (4H, H), b_ih (4H,), b_hh (4H,) with
    gate order [i, f, g, o].  We pre-transpose to (in, 4H) / (H, 4H) and fuse
    the two biases; the gate permutation / block packing happens in the
    wrapper so the reference can use the standard order.
    """
    keys = jax.random.split(key, 10)
    scale = 1.0 / jnp.sqrt(H)
    u = lambda k, s: jax.random.uniform(k, s, jnp.float32, -scale, scale)
    # layer 0
    wx0 = u(keys[0], (I, 4 * H))
    wh0 = u(keys[1], (H, 4 * H))
    b0 = u(keys[2], (1, 4 * H)) + u(keys[3], (1, 4 * H))   # b_ih + b_hh
    # layer 1
    wx1 = u(keys[4], (H, 4 * H))
    wh1 = u(keys[5], (H, 4 * H))
    b1 = u(keys[6], (1, 4 * H)) + u(keys[7], (1, 4 * H))
    # fc: Linear(H*T, num_classes) -> stored transposed (H*T, C)
    w_fc = u(keys[8], (T * H, NUM_CLASSES))
    b_fc = u(keys[9], (1, NUM_CLASSES))
    return (wx0, wh0, b0, wx1, wh1, b1, w_fc, b_fc)


def reference_forward(x, params):
    """Pure-JAX reference (PyTorch gate order, no Pallas) for validation."""
    wx0, wh0, b0, wx1, wh1, b1, w_fc, b_fc = params

    def cell(h, c, inp, wx, wh, b):
        g = inp @ wx + h @ wh + b
        i = jax.nn.sigmoid(g[:, 0 * H:1 * H])
        f = jax.nn.sigmoid(g[:, 1 * H:2 * H])
        gg = jnp.tanh(g[:, 2 * H:3 * H])
        o = jax.nn.sigmoid(g[:, 3 * H:4 * H])
        c = f * c + i * gg
        h = o * jnp.tanh(c)
        return h, c

    h0 = c0 = h1 = c1 = jnp.zeros((N, H), jnp.float32)
    outs = []
    for t in range(T):
        h0, c0 = cell(h0, c0, x[:, t, :], wx0, wh0, b0)
        h1, c1 = cell(h1, c1, h0, wx1, wh1, b1)
        outs.append(h1)
    out = jnp.stack(outs, axis=1).reshape(N, T * H)
    return out @ w_fc + b_fc


if __name__ == "__main__":
    key = jax.random.PRNGKey(0)
    kx, kp = jax.random.split(key)
    x = jax.random.normal(kx, (N, T, I), jnp.float32)
    params = make_params(kp)

    logits = rnn_lstm_forward(x, params)
    logits = jax.block_until_ready(logits)

    ref = reference_forward(x, params)
    assert logits.shape == (N, NUM_CLASSES)
    assert jnp.allclose(logits, ref, rtol=1e-4, atol=1e-4), (
        f"max abs err {jnp.max(jnp.abs(logits - ref))}")

    print("KERNEL_OK")
</pallas_src>

<mosaic_0001>
module attributes {stable_mosaic.version = 11 : i64} {
  func.func @lstm2_fc_kernel(%arg0: memref<64x16xf32, #tpu.memory_space<vmem>>, %arg1: memref<16x128xf32, #tpu.memory_space<vmem>>, %arg2: memref<1x128xf32, #tpu.memory_space<vmem>>, %arg3: memref<64x256xf32, #tpu.memory_space<vmem>>, %arg4: memref<1x128xf32, #tpu.memory_space<vmem>>, %arg5: memref<256x10xf32, #tpu.memory_space<vmem>>, %arg6: memref<1x10xf32, #tpu.memory_space<vmem>>, %arg7: memref<8x10xf32, #tpu.memory_space<vmem>>, %arg8: memref<64x128xf32, #tpu.memory_space<vmem>>, %arg9: memref<8x256xf32, #tpu.memory_space<vmem>>) attributes {dimension_semantics = [], scalar_prefetch = 0 : i64, scratch_operands = 2 : i64, tpu.core_type = #tpu.core_type<tc>} {
    %c0 = arith.constant 0 : index
    %c0_0 = arith.constant 0 : index
    %0 = vector.load %arg0[%c0, %c0_0] : memref<64x16xf32, #tpu.memory_space<vmem>>, vector<64x16xf32>
    %c0_1 = arith.constant 0 : index
    %c0_2 = arith.constant 0 : index
    %1 = vector.load %arg1[%c0_1, %c0_2] : memref<16x128xf32, #tpu.memory_space<vmem>>, vector<16x128xf32>
    %cst = arith.constant dense<0.000000e+00> : vector<64x128xf32>
    %2 = tpu.matmul %0, %1, %cst {dimension_numbers = #tpu.dot_dimension_numbers<[1], [0], [0], [1], [0, 0, 1, 1], [], []>} : vector<64x16xf32>, vector<16x128xf32>, vector<64x128xf32> -> vector<64x128xf32>
    %c0_3 = arith.constant 0 : index
    %c0_4 = arith.constant 0 : index
    %3 = vector.load %arg2[%c0_3, %c0_4] : memref<1x128xf32, #tpu.memory_space<vmem>>, vector<1x128xf32>
    %4 = vector.broadcast %3 : vector<1x128xf32> to vector<64x128xf32>
    %5 = arith.addf %2, %4 : vector<64x128xf32>
    %c0_5 = arith.constant 0 : index
    %c0_6 = arith.constant 0 : index
    %6 = vector.load %arg8[%c0_5, %c0_6] : memref<64x128xf32, #tpu.memory_space<vmem>>, vector<64x128xf32>
    tpu.vector_store %arg8[%c0_5, %c0_6], %5 {strides = array<i32>} : memref<64x128xf32, #tpu.memory_space<vmem>>, vector<64x128xf32>,
    %c0_7 = arith.constant 0 : index
    %c0_8 = arith.constant 0 : index
    %7 = vector.load %arg3[%c0_7, %c0_8] : memref<64x256xf32, #tpu.memory_space<vmem>>, vector<64x256xf32>
    %c0_9 = arith.constant 0 : index
    %c0_10 = arith.constant 0 : index
    %8 = vector.load %arg4[%c0_9, %c0_10] : memref<1x128xf32, #tpu.memory_space<vmem>>, vector<1x128xf32>
    %9 = vector.shape_cast %8 : vector<1x128xf32> to vector<1x128xf32>
    %10 = vector.broadcast %9 : vector<1x128xf32> to vector<8x128xf32>
    %c0_11 = arith.constant 0 : index
    %c0_12 = arith.constant 0 : index
    %11 = vector.load %arg8[%c0_11, %c0_12] : memref<64x128xf32, #tpu.memory_space<vmem>>, vector<8x128xf32>
    %12 = vector.extract_strided_slice %11 {offsets = [0, 0], sizes = [8, 96], strides = [1, 1]} : vector<8x128xf32> to vector<8x96xf32>
    %13 = arith.negf %12 : vector<8x96xf32>
    %14 = math.exp %13 : vector<8x96xf32>
    %cst_13 = arith.constant 1.000000e+00 : f32
    %15 = vector.broadcast %cst_13 : f32 to vector<8x96xf32>
    %16 = arith.addf %15, %14 : vector<8x96xf32>
    %17 = arith.divf %15, %16 : vector<8x96xf32>
    %18 = vector.extract_strided_slice %11 {offsets = [0, 96], sizes = [8, 32], strides = [1, 1]} : vector<8x128xf32> to vector<8x32xf32>
    %19 = math.tanh %18 : vector<8x32xf32>
    %20 = vector.extract_strided_slice %17 {offsets = [0, 0], sizes = [8, 32], strides = [1, 1]} : vector<8x96xf32> to vector<8x32xf32>
    %21 = vector.extract_strided_slice %17 {offsets = [0, 64], sizes = [8, 32], strides = [1, 1]} : vector<8x96xf32> to vector<8x32xf32>
    %22 = arith.mulf %20, %19 : vector<8x32xf32>
    %23 = math.tanh %22 : vector<8x32xf32>
    %24 = arith.mulf %21, %23 : vector<8x32xf32>
    %cst_14 = arith.constant 0.000000e+00 : f32
    %25 = vector.broadcast %cst_14 : f32 to vector<8x32xf32>
    %cst_15 = arith.constant 0.000000e+00 : f32
    %26 = vector.broadcast %cst_15 : f32 to vector<8x32xf32>
    %27 = tpu.concatenate %24, %26 in 1 : vector<8x32xf32>, vector<8x32xf32> -> vector<8x64xf32>
    %cst_16 = arith.constant dense<0.000000e+00> : vector<8x256xf32>
    %28 = tpu.matmul %27, %7, %cst_16 {dimension_numbers = #tpu.dot_dimension_numbers<[1], [0], [0], [1], [0, 0, 1, 1], [], []>} : vector<8x64xf32>, vector<64x256xf32>, vector<8x256xf32> -> vector<8x256xf32>
    %29 = vector.extract_strided_slice %28 {offsets = [0, 128], sizes = [8, 128], strides = [1, 1]} : vector<8x256xf32> to vector<8x128xf32>
    %30 = arith.addf %29, %10 : vector<8x128xf32>
    %31 = vector.extract_strided_slice %30 {offsets = [0, 0], sizes = [8, 96], strides = [1, 1]} : vector<8x128xf32> to vector<8x96xf32>
    %32 = arith.negf %31 : vector<8x96xf32>
    %33 = math.exp %32 : vector<8x96xf32>
    %cst_17 = arith.constant 1.000000e+00 : f32
    %34 = vector.broadcast %cst_17 : f32 to vector<8x96xf32>
    %35 = arith.addf %34, %33 : vector<8x96xf32>
    %36 = arith.divf %34, %35 : vector<8x96xf32>
    %37 = vector.extract_strided_slice %30 {offsets = [0, 96], sizes = [8, 32], strides = [1, 1]} : vector<8x128xf32> to vector<8x32xf32>
    %38 = math.tanh %37 : vector<8x32xf32>
    %39 = vector.extract_strided_slice %36 {offsets = [0, 0], sizes = [8, 32], strides = [1, 1]} : vector<8x96xf32> to vector<8x32xf32>
    %40 = vector.extract_strided_slice %36 {offsets = [0, 32], sizes = [8, 32], strides = [1, 1]} : vector<8x96xf32> to vector<8x32xf32>
    %41 = vector.extract_strided_slice %36 {offsets = [0, 64], sizes = [8, 32], strides = [1, 1]} : vector<8x96xf32> to vector<8x32xf32>
    %42 = arith.mulf %40, %25 : vector<8x32xf32>
    %43 = arith.mulf %39, %38 : vector<8x32xf32>
    %44 = arith.addf %42, %43 : vector<8x32xf32>
    %45 = math.tanh %44 : vector<8x32xf32>
    %46 = arith.mulf %41, %45 : vector<8x32xf32>
    %c0_18 = arith.constant 0 : index
    %c0_19 = arith.constant 0 : index
    %47 = vector.load %arg9[%c0_18, %c0_19] : memref<8x256xf32, #tpu.memory_space<vmem>>, vector<8x32xf32>
    tpu.vector_store %arg9[%c0_18, %c0_19], %46 {strides = array<i32>} : memref<8x256xf32, #tpu.memory_space<vmem>>, vector<8x32xf32>,
    %48 = vector.extract_strided_slice %28 {offsets = [0, 0], sizes = [8, 128], strides = [1, 1]} : vector<8x256xf32> to vector<8x128xf32>
    %c8 = arith.constant 8 : index
    %c0_20 = arith.constant 0 : index
    %49 = vector.load %arg8[%c8, %c0_20] : memref<64x128xf32, #tpu.memory_space<vmem>>, vector<8x128xf32>
    %50 = arith.addf %48, %49 : vector<8x128xf32>
    %51 = vector.extract_strided_slice %50 {offsets = [0, 0], sizes = [8, 96], strides = [1, 1]} : vector<8x128xf32> to vector<8x96xf32>
    %52 = arith.negf %51 : vector<8x96xf32>
    %53 = math.exp %52 : vector<8x96xf32>
    %cst_21 = arith.constant 1.000000e+00 : f32
    %54 = vector.broadcast %cst_21 : f32 to vector<8x96xf32>
    %55 = arith.addf %54, %53 : vector<8x96xf32>
    %56 = arith.divf %54, %55 : vector<8x96xf32>
    %57 = vector.extract_strided_slice %50 {offsets = [0, 96], sizes = [8, 32], strides = [1, 1]} : vector<8x128xf32> to vector<8x32xf32>
    %58 = math.tanh %57 : vector<8x32xf32>
    %59 = vector.extract_strided_slice %56 {offsets = [0, 0], sizes = [8, 32], strides = [1, 1]} : vector<8x96xf32> to vector<8x32xf32>
    %60 = vector.extract_strided_slice %56 {offsets = [0, 32], sizes = [8, 32], strides = [1, 1]} : vector<8x96xf32> to vector<8x32xf32>
    %61 = vector.extract_strided_slice %56 {offsets = [0, 64], sizes = [8, 32], strides = [1, 1]} : vector<8x96xf32> to vector<8x32xf32>
    %62 = arith.mulf %60, %22 : vector<8x32xf32>
    %63 = arith.mulf %59, %58 : vector<8x32xf32>
    %64 = arith.addf %62, %63 : vector<8x32xf32>
    %65 = math.tanh %64 : vector<8x32xf32>
    %66 = arith.mulf %61, %65 : vector<8x32xf32>
    %67 = tpu.concatenate %66, %46 in 1 : vector<8x32xf32>, vector<8x32xf32> -> vector<8x64xf32>
    %cst_22 = arith.constant dense<0.000000e+00> : vector<8x256xf32>
    %68 = tpu.matmul %67, %7, %cst_22 {dimension_numbers = #tpu.dot_dimension_numbers<[1], [0], [0], [1], [0, 0, 1, 1], [], []>} : vector<8x64xf32>, vector<64x256xf32>, vector<8x256xf32> -> vector<8x256xf32>
    %69 = vector.extract_strided_slice %68 {offsets = [0, 128], sizes = [8, 128], strides = [1, 1]} : vector<8x256xf32> to vector<8x128xf32>
    %70 = arith.addf %69, %10 : vector<8x128xf32>
    %71 = vector.extract_strided_slice %70 {offsets = [0, 0], sizes = [8, 96], strides = [1, 1]} : vector<8x128xf32> to vector<8x96xf32>
    %72 = arith.negf %71 : vector<8x96xf32>
    %73 = math.exp %72 : vector<8x96xf32>
    %cst_23 = arith.constant 1.000000e+00 : f32
    %74 = vector.broadcast %cst_23 : f32 to vector<8x96xf32>
    %75 = arith.addf %74, %73 : vector<8x96xf32>
    %76 = arith.divf %74, %75 : vector<8x96xf32>
    %77 = vector.extract_strided_slice %70 {offsets = [0, 96], sizes = [8, 32], strides = [1, 1]} : vector<8x128xf32> to vector<8x32xf32>
    %78 = math.tanh %77 : vector<8x32xf32>
    %79 = vector.extract_strided_slice %76 {offsets = [0, 0], sizes = [8, 32], strides = [1, 1]} : vector<8x96xf32> to vector<8x32xf32>
    %80 = vector.extract_strided_slice %76 {offsets = [0, 32], sizes = [8, 32], strides = [1, 1]} : vector<8x96xf32> to vector<8x32xf32>
    %81 = vector.extract_strided_slice %76 {offsets = [0, 64], sizes = [8, 32], strides = [1, 1]} : vector<8x96xf32> to vector<8x32xf32>
    %82 = arith.mulf %80, %44 : vector<8x32xf32>
    %83 = arith.mulf %79, %78 : vector<8x32xf32>
    %84 = arith.addf %82, %83 : vector<8x32xf32>
    %85 = math.tanh %84 : vector<8x32xf32>
    %86 = arith.mulf %81, %85 : vector<8x32xf32>
    %c0_24 = arith.constant 0 : index
    %c32 = arith.constant 32 : index
    %87 = vector.load %arg9[%c0_24, %c32] : memref<8x256xf32, #tpu.memory_space<vmem>>, vector<8x32xf32>
    tpu.vector_store %arg9[%c0_24, %c32], %86 {strides = array<i32>} : memref<8x256xf32, #tpu.memory_space<vmem>>, vector<8x32xf32>,
    %88 = vector.extract_strided_slice %68 {offsets = [0, 0], sizes = [8, 128], strides = [1, 1]} : vector<8x256xf32> to vector<8x128xf32>
    %c16 = arith.constant 16 : index
    %c0_25 = arith.constant 0 : index
    %89 = vector.load %arg8[%c16, %c0_25] : memref<64x128xf32, #tpu.memory_space<vmem>>, vector<8x128xf32>
    %90 = arith.addf %88, %89 : vector<8x128xf32>
    %91 = vector.extract_strided_slice %90 {offsets = [0, 0], sizes = [8, 96], strides = [1, 1]} : vector<8x128xf32> to vector<8x96xf32>
    %92 = arith.negf %91 : vector<8x96xf32>
    %93 = math.exp %92 : vector<8x96xf32>
    %cst_26 = arith.constant 1.000000e+00 : f32
    %94 = vector.broadcast %cst_26 : f32 to vector<8x96xf32>
    %95 = arith.addf %94, %93 : vector<8x96xf32>
    %96 = arith.divf %94, %95 : vector<8x96xf32>
    %97 = vector.extract_strided_slice %90 {offsets = [0, 96], sizes = [8, 32], strides = [1, 1]} : vector<8x128xf32> to vector<8x32xf32>
    %98 = math.tanh %97 : vector<8x32xf32>
    %99 = vector.extract_strided_slice %96 {offsets = [0, 0], sizes = [8, 32], strides = [1, 1]} : vector<8x96xf32> to vector<8x32xf32>
    %100 = vector.extract_strided_slice %96 {offsets = [0, 32], sizes = [8, 32], strides = [1, 1]} : vector<8x96xf32> to vector<8x32xf32>
    %101 = vector.extract_strided_slice %96 {offsets = [0, 64], sizes = [8, 32], strides = [1, 1]} : vector<8x96xf32> to vector<8x32xf32>
    %102 = arith.mulf %100, %64 : vector<8x32xf32>
    %103 = arith.mulf %99, %98 : vector<8x32xf32>
    %104 = arith.addf %102, %103 : vector<8x32xf32>
    %105 = math.tanh %104 : vector<8x32xf32>
    %106 = arith.mulf %101, %105 : vector<8x32xf32>
    %107 = tpu.concatenate %106, %86 in 1 : vector<8x32xf32>, vector<8x32xf32> -> vector<8x64xf32>
    %cst_27 = arith.constant dense<0.000000e+00> : vector<8x256xf32>
    %108 = tpu.matmul %107, %7, %cst_27 {dimension_numbers = #tpu.dot_dimension_numbers<[1], [0], [0], [1], [0, 0, 1, 1], [], []>} : vector<8x64xf32>, vector<64x256xf32>, vector<8x256xf32> -> vector<8x256xf32>
    %109 = vector.extract_strided_slice %108 {offsets = [0, 128], sizes = [8, 128], strides = [1, 1]} : vector<8x256xf32> to vector<8x128xf32>
    %110 = arith.addf %109, %10 : vector<8x128xf32>
    %111 = vector.extract_strided_slice %110 {offsets = [0, 0], sizes = [8, 96], strides = [1, 1]} : vector<8x128xf32> to vector<8x96xf32>
    %112 = arith.negf %111 : vector<8x96xf32>
    %113 = math.exp %112 : vector<8x96xf32>
    %cst_28 = arith.constant 1.000000e+00 : f32
    %114 = vector.broadcast %cst_28 : f32 to vector<8x96xf32>
    %115 = arith.addf %114, %113 : vector<8x96xf32>
    %116 = arith.divf %114, %115 : vector<8x96xf32>
    %117 = vector.extract_strided_slice %110 {offsets = [0, 96], sizes = [8, 32], strides = [1, 1]} : vector<8x128xf32> to vector<8x32xf32>
    %118 = math.tanh %117 : vector<8x32xf32>
    %119 = vector.extract_strided_slice %116 {offsets = [0, 0], sizes = [8, 32], strides = [1, 1]} : vector<8x96xf32> to vector<8x32xf32>
    %120 = vector.extract_strided_slice %116 {offsets = [0, 32], sizes = [8, 32], strides = [1, 1]} : vector<8x96xf32> to vector<8x32xf32>
    %121 = vector.extract_strided_slice %116 {offsets = [0, 64], sizes = [8, 32], strides = [1, 1]} : vector<8x96xf32> to vector<8x32xf32>
    %122 = arith.mulf %120, %84 : vector<8x32xf32>
    %123 = arith.mulf %119, %118 : vector<8x32xf32>
    %124 = arith.addf %122, %123 : vector<8x32xf32>
    %125 = math.tanh %124 : vector<8x32xf32>
    %126 = arith.mulf %121, %125 : vector<8x32xf32>
    %c0_29 = arith.constant 0 : index
    %c64 = arith.constant 64 : index
    %127 = vector.load %arg9[%c0_29, %c64] : memref<8x256xf32, #tpu.memory_space<vmem>>, vector<8x32xf32>
    tpu.vector_store %arg9[%c0_29, %c64], %126 {strides = array<i32>} : memref<8x256xf32, #tpu.memory_space<vmem>>, vector<8x32xf32>,
    %128 = vector.extract_strided_slice %108 {offsets = [0, 0], sizes = [8, 128], strides = [1, 1]} : vector<8x256xf32> to vector<8x128xf32>
    %c24 = arith.constant 24 : index
    %c0_30 = arith.constant 0 : index
    %129 = vector.load %arg8[%c24, %c0_30] : memref<64x128xf32, #tpu.memory_space<vmem>>, vector<8x128xf32>
    %130 = arith.addf %128, %129 : vector<8x128xf32>
    %131 = vector.extract_strided_slice %130 {offsets = [0, 0], sizes = [8, 96], strides = [1, 1]} : vector<8x128xf32> to vector<8x96xf32>
    %132 = arith.negf %131 : vector<8x96xf32>
    %133 = math.exp %132 : vector<8x96xf32>
    %cst_31 = arith.constant 1.000000e+00 : f32
    %134 = vector.broadcast %cst_31 : f32 to vector<8x96xf32>
    %135 = arith.addf %134, %133 : vector<8x96xf32>
    %136 = arith.divf %134, %135 : vector<8x96xf32>
    %137 = vector.extract_strided_slice %130 {offsets = [0, 96], sizes = [8, 32], strides = [1, 1]} : vector<8x128xf32> to vector<8x32xf32>
    %138 = math.tanh %137 : vector<8x32xf32>
    %139 = vector.extract_strided_slice %136 {offsets = [0, 0], sizes = [8, 32], strides = [1, 1]} : vector<8x96xf32> to vector<8x32xf32>
    %140 = vector.extract_strided_slice %136 {offsets = [0, 32], sizes = [8, 32], strides = [1, 1]} : vector<8x96xf32> to vector<8x32xf32>
    %141 = vector.extract_strided_slice %136 {offsets = [0, 64], sizes = [8, 32], strides = [1, 1]} : vector<8x96xf32> to vector<8x32xf32>
    %142 = arith.mulf %140, %104 : vector<8x32xf32>
    %143 = arith.mulf %139, %138 : vector<8x32xf32>
    %144 = arith.addf %142, %143 : vector<8x32xf32>
    %145 = math.tanh %144 : vector<8x32xf32>
    %146 = arith.mulf %141, %145 : vector<8x32xf32>
    %147 = tpu.concatenate %146, %126 in 1 : vector<8x32xf32>, vector<8x32xf32> -> vector<8x64xf32>
    %cst_32 = arith.constant dense<0.000000e+00> : vector<8x256xf32>
    %148 = tpu.matmul %147, %7, %cst_32 {dimension_numbers = #tpu.dot_dimension_numbers<[1], [0], [0], [1], [0, 0, 1, 1], [], []>} : vector<8x64xf32>, vector<64x256xf32>, vector<8x256xf32> -> vector<8x256xf32>
    %149 = vector.extract_strided_slice %148 {offsets = [0, 128], sizes = [8, 128], strides = [1, 1]} : vector<8x256xf32> to vector<8x128xf32>
    %150 = arith.addf %149, %10 : vector<8x128xf32>
    %151 = vector.extract_strided_slice %150 {offsets = [0, 0], sizes = [8, 96], strides = [1, 1]} : vector<8x128xf32> to vector<8x96xf32>
    %152 = arith.negf %151 : vector<8x96xf32>
    %153 = math.exp %152 : vector<8x96xf32>
    %cst_33 = arith.constant 1.000000e+00 : f32
    %154 = vector.broadcast %cst_33 : f32 to vector<8x96xf32>
    %155 = arith.addf %154, %153 : vector<8x96xf32>
    %156 = arith.divf %154, %155 : vector<8x96xf32>
    %157 = vector.extract_strided_slice %150 {offsets = [0, 96], sizes = [8, 32], strides = [1, 1]} : vector<8x128xf32> to vector<8x32xf32>
    %158 = math.tanh %157 : vector<8x32xf32>
    %159 = vector.extract_strided_slice %156 {offsets = [0, 0], sizes = [8, 32], strides = [1, 1]} : vector<8x96xf32> to vector<8x32xf32>
    %160 = vector.extract_strided_slice %156 {offsets = [0, 32], sizes = [8, 32], strides = [1, 1]} : vector<8x96xf32> to vector<8x32xf32>
    %161 = vector.extract_strided_slice %156 {offsets = [0, 64], sizes = [8, 32], strides = [1, 1]} : vector<8x96xf32> to vector<8x32xf32>
    %162 = arith.mulf %160, %124 : vector<8x32xf32>
    %163 = arith.mulf %159, %158 : vector<8x32xf32>
    %164 = arith.addf %162, %163 : vector<8x32xf32>
    %165 = math.tanh %164 : vector<8x32xf32>
    %166 = arith.mulf %161, %165 : vector<8x32xf32>
    %c0_34 = arith.constant 0 : index
    %c96 = arith.constant 96 : index
    %167 = vector.load %arg9[%c0_34, %c96] : memref<8x256xf32, #tpu.memory_space<vmem>>, vector<8x32xf32>
    tpu.vector_store %arg9[%c0_34, %c96], %166 {strides = array<i32>} : memref<8x256xf32, #tpu.memory_space<vmem>>, vector<8x32xf32>,
    %168 = vector.extract_strided_slice %148 {offsets = [0, 0], sizes = [8, 128], strides = [1, 1]} : vector<8x256xf32> to vector<8x128xf32>
    %c32_35 = arith.constant 32 : index
    %c0_36 = arith.constant 0 : index
    %169 = vector.load %arg8[%c32_35, %c0_36] : memref<64x128xf32, #tpu.memory_space<vmem>>, vector<8x128xf32>
    %170 = arith.addf %168, %169 : vector<8x128xf32>
    %171 = vector.extract_strided_slice %170 {offsets = [0, 0], sizes = [8, 96], strides = [1, 1]} : vector<8x128xf32> to vector<8x96xf32>
    %172 = arith.negf %171 : vector<8x96xf32>
    %173 = math.exp %172 : vector<8x96xf32>
    %cst_37 = arith.constant 1.000000e+00 : f32
    %174 = vector.broadcast %cst_37 : f32 to vector<8x96xf32>
    %175 = arith.addf %174, %173 : vector<8x96xf32>
    %176 = arith.divf %174, %175 : vector<8x96xf32>
    %177 = vector.extract_strided_slice %170 {offsets = [0, 96], sizes = [8, 32], strides = [1, 1]} : vector<8x128xf32> to vector<8x32xf32>
    %178 = math.tanh %177 : vector<8x32xf32>
    %179 = vector.extract_strided_slice %176 {offsets = [0, 0], sizes = [8, 32], strides = [1, 1]} : vector<8x96xf32> to vector<8x32xf32>
    %180 = vector.extract_strided_slice %176 {offsets = [0, 32], sizes = [8, 32], strides = [1, 1]} : vector<8x96xf32> to vector<8x32xf32>
    %181 = vector.extract_strided_slice %176 {offsets = [0, 64], sizes = [8, 32], strides = [1, 1]} : vector<8x96xf32> to vector<8x32xf32>
    %182 = arith.mulf %180, %144 : vector<8x32xf32>
    %183 = arith.mulf %179, %178 : vector<8x32xf32>
    %184 = arith.addf %182, %183 : vector<8x32xf32>
    %185 = math.tanh %184 : vector<8x32xf32>
    %186 = arith.mulf %181, %185 : vector<8x32xf32>
    %187 = tpu.concatenate %186, %166 in 1 : vector<8x32xf32>, vector<8x32xf32> -> vector<8x64xf32>
    %cst_38 = arith.constant dense<0.000000e+00> : vector<8x256xf32>
    %188 = tpu.matmul %187, %7, %cst_38 {dimension_numbers = #tpu.dot_dimension_numbers<[1], [0], [0], [1], [0, 0, 1, 1], [], []>} : vector<8x64xf32>, vector<64x256xf32>, vector<8x256xf32> -> vector<8x256xf32>
    %189 = vector.extract_strided_slice %188 {offsets = [0, 128], sizes = [8, 128], strides = [1, 1]} : vector<8x256xf32> to vector<8x128xf32>
    %190 = arith.addf %189, %10 : vector<8x128xf32>
    %191 = vector.extract_strided_slice %190 {offsets = [0, 0], sizes = [8, 96], strides = [1, 1]} : vector<8x128xf32> to vector<8x96xf32>
    %192 = arith.negf %191 : vector<8x96xf32>
    %193 = math.exp %192 : vector<8x96xf32>
    %cst_39 = arith.constant 1.000000e+00 : f32
    %194 = vector.broadcast %cst_39 : f32 to vector<8x96xf32>
    %195 = arith.addf %194, %193 : vector<8x96xf32>
    %196 = arith.divf %194, %195 : vector<8x96xf32>
    %197 = vector.extract_strided_slice %190 {offsets = [0, 96], sizes = [8, 32], strides = [1, 1]} : vector<8x128xf32> to vector<8x32xf32>
    %198 = math.tanh %197 : vector<8x32xf32>
    %199 = vector.extract_strided_slice %196 {offsets = [0, 0], sizes = [8, 32], strides = [1, 1]} : vector<8x96xf32> to vector<8x32xf32>
    %200 = vector.extract_strided_slice %196 {offsets = [0, 32], sizes = [8, 32], strides = [1, 1]} : vector<8x96xf32> to vector<8x32xf32>
    %201 = vector.extract_strided_slice %196 {offsets = [0, 64], sizes = [8, 32], strides = [1, 1]} : vector<8x96xf32> to vector<8x32xf32>
    %202 = arith.mulf %200, %164 : vector<8x32xf32>
    %203 = arith.mulf %199, %198 : vector<8x32xf32>
    %204 = arith.addf %202, %203 : vector<8x32xf32>
    %205 = math.tanh %204 : vector<8x32xf32>
    %206 = arith.mulf %201, %205 : vector<8x32xf32>
    %c0_40 = arith.constant 0 : index
    %c128 = arith.constant 128 : index
    %207 = vector.load %arg9[%c0_40, %c128] : memref<8x256xf32, #tpu.memory_space<vmem>>, vector<8x32xf32>
    tpu.vector_store %arg9[%c0_40, %c128], %206 {strides = array<i32>} : memref<8x256xf32, #tpu.memory_space<vmem>>, vector<8x32xf32>,
    %208 = vector.extract_strided_slice %188 {offsets = [0, 0], sizes = [8, 128], strides = [1, 1]} : vector<8x256xf32> to vector<8x128xf32>
    %c40 = arith.constant 40 : index
    %c0_41 = arith.constant 0 : index
    %209 = vector.load %arg8[%c40, %c0_41] : memref<64x128xf32, #tpu.memory_space<vmem>>, vector<8x128xf32>
    %210 = arith.addf %208, %209 : vector<8x128xf32>
    %211 = vector.extract_strided_slice %210 {offsets = [0, 0], sizes = [8, 96], strides = [1, 1]} : vector<8x128xf32> to vector<8x96xf32>
    %212 = arith.negf %211 : vector<8x96xf32>
    %213 = math.exp %212 : vector<8x96xf32>
    %cst_42 = arith.constant 1.000000e+00 : f32
    %214 = vector.broadcast %cst_42 : f32 to vector<8x96xf32>
    %215 = arith.addf %214, %213 : vector<8x96xf32>
    %216 = arith.divf %214, %215 : vector<8x96xf32>
    %217 = vector.extract_strided_slice %210 {offsets = [0, 96], sizes = [8, 32], strides = [1, 1]} : vector<8x128xf32> to vector<8x32xf32>
    %218 = math.tanh %217 : vector<8x32xf32>
    %219 = vector.extract_strided_slice %216 {offsets = [0, 0], sizes = [8, 32], strides = [1, 1]} : vector<8x96xf32> to vector<8x32xf32>
    %220 = vector.extract_strided_slice %216 {offsets = [0, 32], sizes = [8, 32], strides = [1, 1]} : vector<8x96xf32> to vector<8x32xf32>
    %221 = vector.extract_strided_slice %216 {offsets = [0, 64], sizes = [8, 32], strides = [1, 1]} : vector<8x96xf32> to vector<8x32xf32>
    %222 = arith.mulf %220, %184 : vector<8x32xf32>
    %223 = arith.mulf %219, %218 : vector<8x32xf32>
    %224 = arith.addf %222, %223 : vector<8x32xf32>
    %225 = math.tanh %224 : vector<8x32xf32>
    %226 = arith.mulf %221, %225 : vector<8x32xf32>
    %227 = tpu.concatenate %226, %206 in 1 : vector<8x32xf32>, vector<8x32xf32> -> vector<8x64xf32>
    %cst_43 = arith.constant dense<0.000000e+00> : vector<8x256xf32>
    %228 = tpu.matmul %227, %7, %cst_43 {dimension_numbers = #tpu.dot_dimension_numbers<[1], [0], [0], [1], [0, 0, 1, 1], [], []>} : vector<8x64xf32>, vector<64x256xf32>, vector<8x256xf32> -> vector<8x256xf32>
    %229 = vector.extract_strided_slice %228 {offsets = [0, 128], sizes = [8, 128], strides = [1, 1]} : vector<8x256xf32> to vector<8x128xf32>
    %230 = arith.addf %229, %10 : vector<8x128xf32>
    %231 = vector.extract_strided_slice %230 {offsets = [0, 0], sizes = [8, 96], strides = [1, 1]} : vector<8x128xf32> to vector<8x96xf32>
    %232 = arith.negf %231 : vector<8x96xf32>
    %233 = math.exp %232 : vector<8x96xf32>
    %cst_44 = arith.constant 1.000000e+00 : f32
    %234 = vector.broadcast %cst_44 : f32 to vector<8x96xf32>
    %235 = arith.addf %234, %233 : vector<8x96xf32>
    %236 = arith.divf %234, %235 : vector<8x96xf32>
    %237 = vector.extract_strided_slice %230 {offsets = [0, 96], sizes = [8, 32], strides = [1, 1]} : vector<8x128xf32> to vector<8x32xf32>
    %238 = math.tanh %237 : vector<8x32xf32>
    %239 = vector.extract_strided_slice %236 {offsets = [0, 0], sizes = [8, 32], strides = [1, 1]} : vector<8x96xf32> to vector<8x32xf32>
    %240 = vector.extract_strided_slice %236 {offsets = [0, 32], sizes = [8, 32], strides = [1, 1]} : vector<8x96xf32> to vector<8x32xf32>
    %241 = vector.extract_strided_slice %236 {offsets = [0, 64], sizes = [8, 32], strides = [1, 1]} : vector<8x96xf32> to vector<8x32xf32>
    %242 = arith.mulf %240, %204 : vector<8x32xf32>
    %243 = arith.mulf %239, %238 : vector<8x32xf32>
    %244 = arith.addf %242, %243 : vector<8x32xf32>
    %245 = math.tanh %244 : vector<8x32xf32>
    %246 = arith.mulf %241, %245 : vector<8x32xf32>
    %c0_45 = arith.constant 0 : index
    %c160 = arith.constant 160 : index
    %247 = vector.load %arg9[%c0_45, %c160] : memref<8x256xf32, #tpu.memory_space<vmem>>, vector<8x32xf32>
    tpu.vector_store %arg9[%c0_45, %c160], %246 {strides = array<i32>} : memref<8x256xf32, #tpu.memory_space<vmem>>, vector<8x32xf32>,
    %248 = vector.extract_strided_slice %228 {offsets = [0, 0], sizes = [8, 128], strides = [1, 1]} : vector<8x256xf32> to vector<8x128xf32>
    %c48 = arith.constant 48 : index
    %c0_46 = arith.constant 0 : index
    %249 = vector.load %arg8[%c48, %c0_46] : memref<64x128xf32, #tpu.memory_space<vmem>>, vector<8x128xf32>
    %250 = arith.addf %248, %249 : vector<8x128xf32>
    %251 = vector.extract_strided_slice %250 {offsets = [0, 0], sizes = [8, 96], strides = [1, 1]} : vector<8x128xf32> to vector<8x96xf32>
    %252 = arith.negf %251 : vector<8x96xf32>
    %253 = math.exp %252 : vector<8x96xf32>
    %cst_47 = arith.constant 1.000000e+00 : f32
    %254 = vector.broadcast %cst_47 : f32 to vector<8x96xf32>
    %255 = arith.addf %254, %253 : vector<8x96xf32>
    %256 = arith.divf %254, %255 : vector<8x96xf32>
    %257 = vector.extract_strided_slice %250 {offsets = [0, 96], sizes = [8, 32], strides = [1, 1]} : vector<8x128xf32> to vector<8x32xf32>
    %258 = math.tanh %257 : vector<8x32xf32>
    %259 = vector.extract_strided_slice %256 {offsets = [0, 0], sizes = [8, 32], strides = [1, 1]} : vector<8x96xf32> to vector<8x32xf32>
    %260 = vector.extract_strided_slice %256 {offsets = [0, 32], sizes = [8, 32], strides = [1, 1]} : vector<8x96xf32> to vector<8x32xf32>
    %261 = vector.extract_strided_slice %256 {offsets = [0, 64], sizes = [8, 32], strides = [1, 1]} : vector<8x96xf32> to vector<8x32xf32>
    %262 = arith.mulf %260, %224 : vector<8x32xf32>
    %263 = arith.mulf %259, %258 : vector<8x32xf32>
    %264 = arith.addf %262, %263 : vector<8x32xf32>
    %265 = math.tanh %264 : vector<8x32xf32>
    %266 = arith.mulf %261, %265 : vector<8x32xf32>
    %267 = tpu.concatenate %266, %246 in 1 : vector<8x32xf32>, vector<8x32xf32> -> vector<8x64xf32>
    %cst_48 = arith.constant dense<0.000000e+00> : vector<8x256xf32>
    %268 = tpu.matmul %267, %7, %cst_48 {dimension_numbers = #tpu.dot_dimension_numbers<[1], [0], [0], [1], [0, 0, 1, 1], [], []>} : vector<8x64xf32>, vector<64x256xf32>, vector<8x256xf32> -> vector<8x256xf32>
    %269 = vector.extract_strided_slice %268 {offsets = [0, 128], sizes = [8, 128], strides = [1, 1]} : vector<8x256xf32> to vector<8x128xf32>
    %270 = arith.addf %269, %10 : vector<8x128xf32>
    %271 = vector.extract_strided_slice %270 {offsets = [0, 0], sizes = [8, 96], strides = [1, 1]} : vector<8x128xf32> to vector<8x96xf32>
    %272 = arith.negf %271 : vector<8x96xf32>
    %273 = math.exp %272 : vector<8x96xf32>
    %cst_49 = arith.constant 1.000000e+00 : f32
    %274 = vector.broadcast %cst_49 : f32 to vector<8x96xf32>
    %275 = arith.addf %274, %273 : vector<8x96xf32>
    %276 = arith.divf %274, %275 : vector<8x96xf32>
    %277 = vector.extract_strided_slice %270 {offsets = [0, 96], sizes = [8, 32], strides = [1, 1]} : vector<8x128xf32> to vector<8x32xf32>
    %278 = math.tanh %277 : vector<8x32xf32>
    %279 = vector.extract_strided_slice %276 {offsets = [0, 0], sizes = [8, 32], strides = [1, 1]} : vector<8x96xf32> to vector<8x32xf32>
    %280 = vector.extract_strided_slice %276 {offsets = [0, 32], sizes = [8, 32], strides = [1, 1]} : vector<8x96xf32> to vector<8x32xf32>
    %281 = vector.extract_strided_slice %276 {offsets = [0, 64], sizes = [8, 32], strides = [1, 1]} : vector<8x96xf32> to vector<8x32xf32>
    %282 = arith.mulf %280, %244 : vector<8x32xf32>
    %283 = arith.mulf %279, %278 : vector<8x32xf32>
    %284 = arith.addf %282, %283 : vector<8x32xf32>
    %285 = math.tanh %284 : vector<8x32xf32>
    %286 = arith.mulf %281, %285 : vector<8x32xf32>
    %c0_50 = arith.constant 0 : index
    %c192 = arith.constant 192 : index
    %287 = vector.load %arg9[%c0_50, %c192] : memref<8x256xf32, #tpu.memory_space<vmem>>, vector<8x32xf32>
    tpu.vector_store %arg9[%c0_50, %c192], %286 {strides = array<i32>} : memref<8x256xf32, #tpu.memory_space<vmem>>, vector<8x32xf32>,
    %288 = vector.extract_strided_slice %268 {offsets = [0, 0], sizes = [8, 128], strides = [1, 1]} : vector<8x256xf32> to vector<8x128xf32>
    %c56 = arith.constant 56 : index
    %c0_51 = arith.constant 0 : index
    %289 = vector.load %arg8[%c56, %c0_51] : memref<64x128xf32, #tpu.memory_space<vmem>>, vector<8x128xf32>
    %290 = arith.addf %288, %289 : vector<8x128xf32>
    %291 = vector.extract_strided_slice %290 {offsets = [0, 0], sizes = [8, 96], strides = [1, 1]} : vector<8x128xf32> to vector<8x96xf32>
    %292 = arith.negf %291 : vector<8x96xf32>
    %293 = math.exp %292 : vector<8x96xf32>
    %cst_52 = arith.constant 1.000000e+00 : f32
    %294 = vector.broadcast %cst_52 : f32 to vector<8x96xf32>
    %295 = arith.addf %294, %293 : vector<8x96xf32>
    %296 = arith.divf %294, %295 : vector<8x96xf32>
    %297 = vector.extract_strided_slice %290 {offsets = [0, 96], sizes = [8, 32], strides = [1, 1]} : vector<8x128xf32> to vector<8x32xf32>
    %298 = math.tanh %297 : vector<8x32xf32>
    %299 = vector.extract_strided_slice %296 {offsets = [0, 0], sizes = [8, 32], strides = [1, 1]} : vector<8x96xf32> to vector<8x32xf32>
    %300 = vector.extract_strided_slice %296 {offsets = [0, 32], sizes = [8, 32], strides = [1, 1]} : vector<8x96xf32> to vector<8x32xf32>
    %301 = vector.extract_strided_slice %296 {offsets = [0, 64], sizes = [8, 32], strides = [1, 1]} : vector<8x96xf32> to vector<8x32xf32>
    %302 = arith.mulf %300, %264 : vector<8x32xf32>
    %303 = arith.mulf %299, %298 : vector<8x32xf32>
    %304 = arith.addf %302, %303 : vector<8x32xf32>
    %305 = math.tanh %304 : vector<8x32xf32>
    %306 = arith.mulf %301, %305 : vector<8x32xf32>
    %307 = tpu.concatenate %306, %286 in 1 : vector<8x32xf32>, vector<8x32xf32> -> vector<8x64xf32>
    %cst_53 = arith.constant dense<0.000000e+00> : vector<8x256xf32>
    %308 = tpu.matmul %307, %7, %cst_53 {dimension_numbers = #tpu.dot_dimension_numbers<[1], [0], [0], [1], [0, 0, 1, 1], [], []>} : vector<8x64xf32>, vector<64x256xf32>, vector<8x256xf32> -> vector<8x256xf32>
    %309 = vector.extract_strided_slice %308 {offsets = [0, 128], sizes = [8, 128], strides = [1, 1]} : vector<8x256xf32> to vector<8x128xf32>
    %310 = arith.addf %309, %10 : vector<8x128xf32>
    %311 = vector.extract_strided_slice %310 {offsets = [0, 0], sizes = [8, 96], strides = [1, 1]} : vector<8x128xf32> to vector<8x96xf32>
    %312 = arith.negf %311 : vector<8x96xf32>
    %313 = math.exp %312 : vector<8x96xf32>
    %cst_54 = arith.constant 1.000000e+00 : f32
    %314 = vector.broadcast %cst_54 : f32 to vector<8x96xf32>
    %315 = arith.addf %314, %313 : vector<8x96xf32>
    %316 = arith.divf %314, %315 : vector<8x96xf32>
    %317 = vector.extract_strided_slice %310 {offsets = [0, 96], sizes = [8, 32], strides = [1, 1]} : vector<8x128xf32> to vector<8x32xf32>
    %318 = math.tanh %317 : vector<8x32xf32>
    %319 = vector.extract_strided_slice %316 {offsets = [0, 0], sizes = [8, 32], strides = [1, 1]} : vector<8x96xf32> to vector<8x32xf32>
    %320 = vector.extract_strided_slice %316 {offsets = [0, 32], sizes = [8, 32], strides = [1, 1]} : vector<8x96xf32> to vector<8x32xf32>
    %321 = vector.extract_strided_slice %316 {offsets = [0, 64], sizes = [8, 32], strides = [1, 1]} : vector<8x96xf32> to vector<8x32xf32>
    %322 = arith.mulf %320, %284 : vector<8x32xf32>
    %323 = arith.mulf %319, %318 : vector<8x32xf32>
    %324 = arith.addf %322, %323 : vector<8x32xf32>
    %325 = math.tanh %324 : vector<8x32xf32>
    %326 = arith.mulf %321, %325 : vector<8x32xf32>
    %c0_55 = arith.constant 0 : index
    %c224 = arith.constant 224 : index
    %327 = vector.load %arg9[%c0_55, %c224] : memref<8x256xf32, #tpu.memory_space<vmem>>, vector<8x32xf32>
    tpu.vector_store %arg9[%c0_55, %c224], %326 {strides = array<i32>} : memref<8x256xf32, #tpu.memory_space<vmem>>, vector<8x32xf32>,
    %c0_56 = arith.constant 0 : index
    %c0_57 = arith.constant 0 : index
    %328 = vector.load %arg9[%c0_56, %c0_57] : memref<8x256xf32, #tpu.memory_space<vmem>>, vector<8x256xf32>
    %c0_58 = arith.constant 0 : index
    %c0_59 = arith.constant 0 : index
    %329 = vector.load %arg5[%c0_58, %c0_59] : memref<256x10xf32, #tpu.memory_space<vmem>>, vector<256x10xf32>
    %cst_60 = arith.constant dense<0.000000e+00> : vector<8x10xf32>
    %330 = tpu.matmul %328, %329, %cst_60 {dimension_numbers = #tpu.dot_dimension_numbers<[1], [0], [0], [1], [0, 0, 1, 1], [], []>} : vector<8x256xf32>, vector<256x10xf32>, vector<8x10xf32> -> vector<8x10xf32>
    %c0_61 = arith.constant 0 : index
    %c0_62 = arith.constant 0 : index
    %331 = vector.load %arg6[%c0_61, %c0_62] : memref<1x10xf32, #tpu.memory_space<vmem>>, vector<1x10xf32>
    %332 = vector.broadcast %331 : vector<1x10xf32> to vector<8x10xf32>
    %333 = arith.addf %330, %332 : vector<8x10xf32>
    %c0_63 = arith.constant 0 : index
    %c0_64 = arith.constant 0 : index
    %334 = vector.load %arg7[%c0_63, %c0_64] : memref<8x10xf32, #tpu.memory_space<vmem>>, vector<8x10xf32>
    tpu.vector_store %arg7[%c0_63, %c0_64], %333 {strides = array<i32>} : memref<8x10xf32, #tpu.memory_space<vmem>>, vector<8x10xf32>,
    return
  }
}

</mosaic_0001>

<bundles_post_ra>
// kernel: rnn_lstm_forward.1
= control target key start
LH: loop header
LB: loop body
LE: loop exit
PB: predicated region body
PF: predicated region fallthrough
CT: control target
= control target key end

     0   :  { %vm44_vm0 = vcmask 130048   ;;  %s2342_s0 = inlined_call_operand.vmem [shape: f32[64,16], index: 0, kind: input, shape index: {}]   ;;  %s2343_s1 = inlined_call_operand.vmem [shape: f32[16,128], index: 1, kind: input, shape index: {}]   ;;  %s2344_s2 = inlined_call_operand.vmem [shape: f32[1,128], index: 2, kind: input, shape index: {}]   ;;  %s2345_s3 = inlined_call_operand.vmem [shape: f32[64,256], index: 3, kind: input, shape index: {}]   ;;  %s2346_s4 = inlined_call_operand.vmem [shape: f32[1,128], index: 4, kind: input, shape index: {}]   ;;  %s2347_s5 = inlined_call_operand.vmem [shape: f32[256,10], index: 5, kind: input, shape index: {}]   ;;  %s2348_s6 = inlined_call_operand.vmem [shape: f32[1,10], index: 6, kind: input, shape index: {}]   ;;  %s2349_s7 = inlined_call_operand.hbm [shape: f32[8,10], index: 7, kind: output, shape index: {}]  }
   0x1   :  { %v35_v0 = vld [vmem:[%s2343_s1] sm:$0xff]  ;;  %v36_v1 = vld [vmem:[%s2343_s1 + $0x8] sm:$0xff] }
   0x2   :  { %v27_v2 = vld [vmem:[%s2342_s0] sm:$0xff]  ;;  %v1518_v3 = vpack.c.bf16 %v36_v1, %v35_v0 }
   0x3   :  { %1506 = vmatprep.mubr.msk.f32.mxu0 %vm44_vm0, %v27_v2 }
   0x4   :  { %12 = vsyncpa [#allocation5], 0  ;;  %1519 = vmatprep.subr.bf16.mxu0 %v1518_v3  ;;  %v28_v4 = vld [vmem:[%s2342_s0 + $0x8] sm:$0xff]  ;;  %v1901_v5 = vld [vmem:[%s2344_s2] ss:$0 sm:$0xff]  ;;  %s1839_s1 = smov 32  }
   0x5   :  { %1521 = vmatpush3.bf16.msra.mxu0 %v1518_v3  ;;  %v183_v16 = vld [vmem:[%s2345_s3 + $0x8] sm:$0xff]  ;;  %v185_v17 = vld [vmem:[%s2345_s3 + $0x18] sm:$0xff]  ;;  %v182_v18 = vld [vmem:[%s2345_s3] sm:$0xff]  ;;  %s1840_s30 = smov 64   ;;  %v1841_v47 = vmov 0.0   ;;  %vm228_vm1 = vcmask 261120  }
   0x6   :  { %v1922_v19 = vpack.c.bf16 %v185_v17, %v183_v16  ;;  %v184_v20 = vld [vmem:[%s2345_s3 + $0x10] sm:$0xff]  ;;  %v30_v22 = vld [vmem:[%s2342_s0 + $0x18] sm:$0xff]  ;;  %v187_v24 = vld [vmem:[%s2345_s3 + $0x28] sm:$0xff]  ;;  %576 = vmatprep.mubr.f32.mxu1 %v1841_v47  ;;  %vm230_vm2 = vcmask 523264   ;;  %vm476_vm3 = vcmask 523520   ;;  %vm608_vm4 = vcmask 785920  }
   0x7   :  { %v29_v21 = vld [vmem:[%s2342_s0 + $0x10] sm:$0xff]  ;;  %v1933_v23 = vpack.c.bf16 %v184_v20, %v182_v18  ;;  %v189_v25 = vld [vmem:[%s2345_s3 + $0x38] sm:$0xff]  ;;  %v186_v26 = vld [vmem:[%s2345_s3 + $0x20] sm:$0xff]  ;;  %vm748_vm5 = vcmask 1048320   ;;  %s1843_s17 = smov [#allocation4]   ;;  %vm1406_vm6 = vcmask 80896  }
   0x8   :  { %1507 = vmatmul.mubr.msk.f32.vlgmr.msra.gmra.mrb[0].mxu0 %vm44_vm0, %v28_v4  ;;  %1523 = vmatprep.subr.bf16.mxu0 %v1922_v19  ;;  %v1947_v27 = vpack.c.bf16 %v189_v25, %v187_v24  ;;  %v188_v28 = vld [vmem:[%s2345_s3 + $0x30] sm:$0xff]  ;;  %v31_v29 = vld [vmem:[%s2342_s0 + $0x20] sm:$0xff]  ;;  %v32_v31 = vld [vmem:[%s2342_s0 + $0x28] sm:$0xff]  ;;  %s1414_s18 = sshll.u32 %s1843_s17, 4  ;;  %s1415_s18 = int_to_ptr.vmem [resolvable:$true] %s1414_s18 }
   0x9   :  { %1509 = vmatprep.mubr.msk.f32.mxu0 %vm44_vm0, %v29_v21  ;;  %1525 = vmatpush1.bf16.msra.mxu0 %v1933_v23  ;;  %v1956_v30 = vpack.c.bf16 %v188_v28, %v186_v26  ;;  %v191_v32 = vld [vmem:[%s2345_s3 + $0x48] sm:$0xff]  ;;  %v193_v33 = vld [vmem:[%s2345_s3 + $0x58] sm:$0xff]  ;;  %v190_v35 = vld [vmem:[%s2345_s3 + $0x40] sm:$0xff]  ;;  %s1815_s19 = scalar_lea.vmem %s1415_s18, 128  ;;  %p1820_p1 = scmp.lt.s32.totalorder %s1415_s18, %s1415_s18 }
   0xa   :  { %1527 = vmatprep.subr.bf16.mxu0 %v1947_v27  ;;  %v1969_v34 = vpack.c.bf16 %v193_v33, %v191_v32  ;;  %v192_v36 = vld [vmem:[%s2345_s3 + $0x50] sm:$0xff]  ;;  %1555 = vmatprep.subr.bf16.mxu1 %v1922_v19  ;;  %v195_v38 = vld [vmem:[%s2345_s3 + $0x68] sm:$0xff]  ;;  %v197_v39 = vld [vmem:[%s2345_s3 + $0x78] sm:$0xff]  ;;  %p1816_p0 = scmp.ne.s32.totalorder %s1415_s18, %s1815_s19  ;;  %p1821_p2 = scmp.lt.s32.totalorder %s1815_s19, %s1815_s19 }
   0xb   :  { %v33_v37 = vld [vmem:[%s2342_s0 + $0x30] sm:$0xff]  ;;  %1557 = vmatpush1.bf16.msra.mxu1 %v1933_v23  ;;  %v1991_v40 = vpack.c.bf16 %v192_v36, %v190_v35  ;;  %v34_v41 = vld [vmem:[%s2342_s0 + $0x38] sm:$0xff]  ;;  %v1998_v42 = vpack.c.bf16 %v197_v39, %v195_v38  ;;  %v194_v43 = vld [vmem:[%s2345_s3 + $0x60] sm:$0xff] }
   0xc   :  { %1510 = vmatmul.mubr.msk.f32.gmra.mrb[2].mxu0 %vm44_vm0, %v30_v22  ;;  %1559 = vmatprep.subr.bf16.mxu1 %v1947_v27  ;;  %v196_v44 = vld [vmem:[%s2345_s3 + $0x70] sm:$0xff]  ;;  %v2052_v59 = vld [vmem:[%s2346_s4] ss:$0 sm:$0xff]  ;;  %s1842_s4 = smov 96   ;;  %p1822_p3 = por %p1821_p2, %p1820_p1 }
   0xd   :  { %1512 = vmatprep.mubr.msk.f32.mxu0 %vm44_vm0, %v31_v29  ;;  %1529 = vmatpush1.bf16.msra.mxu0 %v1956_v30  ;;  %v2010_v46 = vpack.c.bf16 %v196_v44, %v194_v43 }
   0xe   :  { %1531 = vmatprep.subr.bf16.mxu0 %v1969_v34  ;;  %p1823_p4 = pnand %p1822_p3, %p1816_p0 }
   0xf   :  { %1561 = vmatpush1.bf16.msra.mxu1 %v1956_v30 }
  0x10   :  { %1513 = vmatmul.mubr.msk.f32.gmra.mrb[4].mxu0 %vm44_vm0, %v32_v31  ;;  %1563 = vmatprep.subr.bf16.mxu1 %v1969_v34 }
  0x11   :  { %1515 = vmatprep.mubr.msk.f32.mxu0 %vm44_vm0, %v33_v37  ;;  %1533 = vmatpush1.bf16.msra.mxu0 %v1991_v40 }
  0x12   :  { %1535 = vmatprep.subr.bf16.mxu0 %v1998_v42 }
  0x13   :  { %1565 = vmatpush1.bf16.msra.mxu1 %v1991_v40 }
  0x14   :  { %1516 = vmatmul.mubr.msk.f32.gmra.mrb[6].mxu0 %vm44_vm0, %v34_v41  ;;  %1567 = vmatprep.subr.bf16.mxu1 %v1998_v42 }
  0x15   :  { %1537 = vmatpush1.bf16.msra.mxu0 %v2010_v46  ;;  %298 = vmatprep.mubr.f32.mxu0 %v1841_v47 }
  0x16   :  { %1539 = vmatprep.subr.bf16.mxu0 %v1922_v19 }
  0x17   :  { %1569 = vmatpush1.bf16.msra.mxu1 %v2010_v46 }
  0x18   :  { %1587 = vmatprep.subr.bf16.mxu1 %v1922_v19 }
  0xdb   :  { %v1903_v6 = vpop.f32.mrb[0].mxu0 }
  0xdc   :  { %v135_v7 = vpop.f32.mrb[1].mxu0  ;;  %v141_v58 = vadd.f32 %v1903_v6, %v1901_v5 }
  0xdd   :  { %v136_v8 = vadd.f32 %v1901_v5, %v135_v7 }
  0xdf   :  { %1687 = vtanh.f32 %v136_v8  ;;  %v1432_v10 = vmul.f32 -1.442695, %v136_v8  ;;  %v2024_v50 = vpop.f32.mrb[2].mxu0 }
  0xe0   :  { %v2026_v51 = vpop.f32.mrb[3].mxu0 }
  0xe1   :  { %1689 = vpow2.f32 %v1432_v10  ;;  %v146_v36 = vadd.f32 %v1901_v5, %v2026_v51 }
  0xe3   :  { %v2028_v52 = vpop.f32.mrb[4].mxu0 }
  0xe4   :  { %v2030_v53 = vpop.f32.mrb[5].mxu0 }
  0xe7   :  { %v2032_v54 = vpop.f32.mrb[6].mxu0 }
  0xe8   :  { %v2034_v55 = vpop.f32.mrb[7].mxu0 }
  0xe9   :  { %v1688_v9 = vpop.eup %1687 }
  0xea   :  { %214 = vrot.lane.b32.xlu0 %v1688_v9, %s1839_s1 }
  0xeb   :  { %v1690_v11 = vpop.eup %1689 }
  0xec   :  { %v209_v12 = vadd.f32 1.0, %v1690_v11 }
  0xee   :  { %1691 = vrcp.f32 %v209_v12 }
  0xf8   :  { %v1907_v13 = vpop.eup %1691 }
 0x15c   :  { %v215_v14 = vpop.permute.xlu0 %214 }
 0x15d   :  { %v1910_v15 = vmul.f32 %v1907_v13, %v215_v14 }
 0x15f   :  { %1693 = vtanh.f32 %v1910_v15 }
 0x169   :  { %v1694_v45 = vpop.eup %1693 }
 0x16a   :  { %220 = vrot.lane.b32.xlu0 %v1694_v45, %s1840_s30 }
 0x1dc   :  { %v221_v48 = vpop.permute.xlu0 %220 }
 0x1dd   :  { %v223_v49 = vmul.f32 %v1907_v13, %v221_v48 }
 0x1df   :  { %225 = vrot.lane.b32.xlu1 %v223_v49, %s1840_s30 }
 0x251   :  { %v226_v56 = vpop.permute.xlu1 %225 }
 0x252   :  { %v229_v57 = vsel %vm228_vm1, %v226_v56, 0.0 }
 0x253   :  { %1433 = vmatmul.mubr.msk.f32.vlgmr.msra.gmra.mrb[8].mxu0 %vm230_vm2, %v229_v57 }
 0x254   :  { %1541 = vmatpush1.bf16.msra.mxu0 %v1933_v23  ;;  %440 = vmatprep.mubr.f32.mxu0 %v1841_v47 }
 0x255   :  { %1543 = vmatprep.subr.bf16.mxu0 %v1947_v27 }
 0x258   :  { %1545 = vmatpush1.bf16.msra.mxu0 %v1956_v30 }
 0x259   :  { %1547 = vmatprep.subr.bf16.mxu0 %v1969_v34 }
 0x25c   :  { %1549 = vmatpush1.bf16.msra.mxu0 %v1991_v40 }
 0x25d   :  { %1551 = vmatprep.subr.bf16.mxu0 %v1998_v42 }
 0x260   :  { %1553 = vmatpush1.bf16.msra.mxu0 %v2010_v46 }
 0x261   :  { %1571 = vmatprep.subr.bf16.mxu0 %v1922_v19 }
 0x326   :  { %v300_v60 = vpop.f32.mrb[8].mxu0 }
 0x327   :  { %v336_v61 = vadd.f32 %v300_v60, %v141_v58  ;;  %v302_v62 = vpop.f32.mrb[9].mxu0 }
 0x328   :  { %v305_v63 = vadd.f32 %v2052_v59, %v302_v62 }
 0x329   :  { %1695 = vtanh.f32 %v336_v61  ;;  %v1435_v2 = vmul.f32 -1.442695, %v336_v61 }
 0x32a   :  { %1697 = vtanh.f32 %v305_v63  ;;  %v1434_v3 = vmul.f32 -1.442695, %v305_v63 }
 0x32b   :  { %1699 = vpow2.f32 %v1435_v2 }
 0x32c   :  { %1701 = vpow2.f32 %v1434_v3 }
 0x333   :  { %v1696_v0 = vpop.eup %1695 }
 0x334   :  { %v1698_v1 = vpop.eup %1697  ;;  %350 = vrot.lane.b32.xlu0 %v1696_v0, %s1839_s1 }
 0x335   :  { %315 = vrot.lane.b32.xlu1 %v1698_v1, %s1839_s1  ;;  %v1700_v4 = vpop.eup %1699 }
 0x336   :  { %v1702_v6 = vpop.eup %1701  ;;  %v340_v7 = vadd.f32 1.0, %v1700_v4 }
 0x337   :  { %v309_v8 = vadd.f32 1.0, %v1702_v6 }
 0x338   :  { %1703 = vrcp.f32 %v340_v7 }
 0x339   :  { %345 = vrot.lane.b32.xlu1 %v1910_v15, %s1839_s1  ;;  %1705 = vrcp.f32 %v309_v8 }
 0x342   :  { %v1704_v9 = vpop.eup %1703 }
 0x343   :  { %v1706_v11 = vpop.eup %1705 }
 0x344   :  { %v313_v18 = vmul.f32 0.0, %v1706_v11 }
 0x3a6   :  { %v351_v10 = vpop.permute.xlu0 %350 }
 0x3a7   :  { %v353_v12 = vmul.f32 %v1704_v9, %v351_v10  ;;  %v316_v13 = vpop.permute.xlu1 %315 }
 0x3a8   :  { %v318_v14 = vmul.f32 %v1706_v11, %v316_v13 }
 0x3a9   :  { %355 = vrot.lane.b32.xlu1 %v353_v12, %s1839_s1 }
 0x3aa   :  { %320 = vrot.lane.b32.xlu0 %v318_v14, %s1839_s1 }
 0x3ab   :  { %v346_v15 = vpop.permute.xlu1 %345 }
 0x3ac   :  { %v348_v16 = vmul.f32 %v1704_v9, %v346_v15 }
 0x41b   :  { %v356_v17 = vpop.permute.xlu1 %355 }
 0x41c   :  { %v358_v20 = vadd.f32 %v356_v17, %v348_v16  ;;  %v321_v21 = vpop.permute.xlu0 %320  ;;  %v151_v17 = vadd.f32 %v2024_v50, %v1901_v5 }
 0x41d   :  { %v323_v22 = vadd.f32 %v321_v21, %v313_v18 }
 0x41e   :  { %1707 = vtanh.f32 %v358_v20 }
 0x41f   :  { %1709 = vtanh.f32 %v323_v22 }
 0x428   :  { %v1708_v24 = vpop.eup %1707 }
 0x429   :  { %v1710_v25 = vpop.eup %1709  ;;  %361 = vrot.lane.b32.xlu1 %v1708_v24, %s1839_s1 }
 0x42a   :  { %326 = vrot.lane.b32.xlu0 %v1710_v25, %s1839_s1 }
 0x49b   :  { %v362_v26 = vpop.permute.xlu1 %361 }
 0x49c   :  { %v364_v28 = vmul.f32 %v1704_v9, %v362_v26  ;;  %v327_v29 = vpop.permute.xlu0 %326 }
 0x49d   :  { %v2063_v31 = vmul.f32 %v1706_v11, %v327_v29 }
 0x49e   :  { %366 = vrot.lane.b32.xlu0 %v364_v28, %s1840_s30 }
 0x49f   :  { %369 = vrot.lane.b32.xlu1 %v2063_v31, %s1842_s4 }
 0x510   :  { %v367_v32 = vpop.permute.xlu0 %366 }
 0x511   :  { %v370_v33 = vpop.permute.xlu1 %369 }
 0x512   :  { %v372_v35 = vsel %vm228_vm1, %v367_v32, %v370_v33 }
 0x513   :  { %1436 = vmatmul.mubr.msk.f32.vlgmr.msra.gmra.mrb[10].mxu0 %vm230_vm2, %v372_v35 }
 0x514   :  { %1573 = vmatpush1.bf16.msra.mxu0 %v1933_v23  ;;  %712 = vmatprep.mubr.f32.mxu0 %v1841_v47 }
 0x515   :  { %1575 = vmatprep.subr.bf16.mxu0 %v1947_v27 }
 0x518   :  { %1577 = vmatpush1.bf16.msra.mxu0 %v1956_v30 }
 0x519   :  { %1579 = vmatprep.subr.bf16.mxu0 %v1969_v34 }
 0x51c   :  { %1581 = vmatpush1.bf16.msra.mxu0 %v1991_v40 }
 0x51d   :  { %1583 = vmatprep.subr.bf16.mxu0 %v1998_v42 }
 0x520   :  { %1585 = vmatpush1.bf16.msra.mxu0 %v2010_v46 }
 0x521   :  { %1603 = vmatprep.subr.bf16.mxu0 %v1922_v19 }
 0x5e6   :  { %v442_v37 = vpop.f32.mrb[10].mxu0 }
 0x5e7   :  { %v479_v38 = vadd.f32 %v442_v37, %v146_v36  ;;  %v444_v39 = vpop.f32.mrb[11].mxu0 }
 0x5e8   :  { %v447_v41 = vadd.f32 %v2052_v59, %v444_v39 }
 0x5e9   :  { %1711 = vtanh.f32 %v479_v38  ;;  %v1438_v45 = vmul.f32 -1.442695, %v479_v38 }
 0x5ea   :  { %1713 = vtanh.f32 %v447_v41  ;;  %v1437_v48 = vmul.f32 -1.442695, %v447_v41 }
 0x5eb   :  { %1715 = vpow2.f32 %v1438_v45 }
 0x5ec   :  { %1717 = vpow2.f32 %v1437_v48 }
 0x5f3   :  { %v1712_v43 = vpop.eup %1711 }
 0x5f4   :  { %v1714_v44 = vpop.eup %1713  ;;  %489 = vrot.lane.b32.xlu1 %v1712_v43, %s1839_s1 }
 0x5f5   :  { %457 = vrot.lane.b32.xlu0 %v1714_v44, %s1839_s1  ;;  %v1716_v49 = vpop.eup %1715 }
 0x5f6   :  { %v1718_v56 = vpop.eup %1717  ;;  %v483_v51 = vadd.f32 1.0, %v1716_v49 }
 0x5f7   :  { %v451_v57 = vadd.f32 1.0, %v1718_v56 }
 0x5f8   :  { %1719 = vrcp.f32 %v483_v51 }
 0x5f9   :  { %1721 = vrcp.f32 %v451_v57 }
 0x602   :  { %v1720_v58 = vpop.eup %1719 }
 0x603   :  { %v1722_v61 = vpop.eup %1721  ;;  %v487_v1 = vmul.f32 %v1720_v58, %v358_v20 }
 0x604   :  { %v455_v3 = vmul.f32 %v1722_v61, %v323_v22 }
 0x666   :  { %v490_v60 = vpop.permute.xlu1 %489 }
 0x667   :  { %v492_v62 = vmul.f32 %v1720_v58, %v490_v60  ;;  %v458_v63 = vpop.permute.xlu0 %457 }
 0x668   :  { %v460_v0 = vmul.f32 %v1722_v61, %v458_v63 }
 0x669   :  { %494 = vrot.lane.b32.xlu1 %v492_v62, %s1839_s1 }
 0x66a   :  { %462 = vrot.lane.b32.xlu0 %v460_v0, %s1839_s1 }
 0x6db   :  { %v495_v2 = vpop.permute.xlu1 %494 }
 0x6dc   :  { %v497_v4 = vadd.f32 %v495_v2, %v487_v1  ;;  %v463_v6 = vpop.permute.xlu0 %462  ;;  %v156_v2 = vadd.f32 %v1901_v5, %v2030_v53 }
 0x6dd   :  { %v465_v7 = vadd.f32 %v463_v6, %v455_v3 }
 0x6de   :  { %1723 = vtanh.f32 %v497_v4 }
 0x6df   :  { %1725 = vtanh.f32 %v465_v7 }
 0x6e8   :  { %v1724_v8 = vpop.eup %1723 }
 0x6e9   :  { %v1726_v9 = vpop.eup %1725  ;;  %500 = vrot.lane.b32.xlu1 %v1724_v8, %s1839_s1 }
 0x6ea   :  { %468 = vrot.lane.b32.xlu0 %v1726_v9, %s1839_s1 }
 0x75b   :  { %v501_v10 = vpop.permute.xlu1 %500 }
 0x75c   :  { %v503_v11 = vmul.f32 %v1720_v58, %v501_v10  ;;  %v469_v12 = vpop.permute.xlu0 %468 }
 0x75d   :  { %v471_v13 = vmul.f32 %v1722_v61, %v469_v12 }
 0x75e   :  { %505 = vrot.lane.b32.xlu1 %v503_v11, %s1840_s30 }
 0x75f   :  { %473 = vrot.lane.b32.xlu0 %v471_v13, %s1842_s4 }
 0x7d0   :  { %v506_v14 = vpop.permute.xlu1 %505 }
 0x7d1   :  { %v2090_v15 = vpop.permute.xlu0 %473 }
 0x7d2   :  { %v508_v16 = vsel %vm228_vm1, %v506_v14, %v2090_v15 }
 0x7d3   :  { %1439 = vmatmul.mubr.msk.f32.vlgmr.msra.gmra.mrb[0].mxu1 %vm230_vm2, %v508_v16 }
 0x7d4   :  { %1589 = vmatpush1.bf16.msra.mxu1 %v1933_v23  ;;  %851 = vmatprep.mubr.f32.mxu1 %v1841_v47 }
 0x7d5   :  { %1591 = vmatprep.subr.bf16.mxu1 %v1947_v27 }
 0x7d8   :  { %1593 = vmatpush1.bf16.msra.mxu1 %v1956_v30 }
 0x7d9   :  { %1595 = vmatprep.subr.bf16.mxu1 %v1969_v34 }
 0x7dc   :  { %1597 = vmatpush1.bf16.msra.mxu1 %v1991_v40 }
 0x7dd   :  { %1599 = vmatprep.subr.bf16.mxu1 %v1998_v42 }
 0x7e0   :  { %1601 = vmatpush1.bf16.msra.mxu1 %v2010_v46 }
 0x7e1   :  { %1619 = vmatprep.subr.bf16.mxu1 %v1922_v19 }
 0x8a6   :  { %v578_v18 = vpop.f32.mrb[0].mxu1 }
 0x8a7   :  { %v611_v20 = vadd.f32 %v578_v18, %v151_v17  ;;  %v580_v21 = vpop.f32.mrb[1].mxu1 }
 0x8a8   :  { %v583_v22 = vadd.f32 %v2052_v59, %v580_v21 }
 0x8a9   :  { %1727 = vtanh.f32 %v611_v20  ;;  %v1441_v26 = vmul.f32 -1.442695, %v611_v20 }
 0x8aa   :  { %1729 = vtanh.f32 %v583_v22  ;;  %v1440_v28 = vmul.f32 -1.442695, %v583_v22 }
 0x8ab   :  { %1731 = vpow2.f32 %v1441_v26 }
 0x8ac   :  { %1733 = vpow2.f32 %v1440_v28 }
 0x8b3   :  { %v1728_v24 = vpop.eup %1727 }
 0x8b4   :  { %v1730_v25 = vpop.eup %1729  ;;  %621 = vrot.lane.b32.xlu1 %v1728_v24, %s1839_s1 }
 0x8b5   :  { %593 = vrot.lane.b32.xlu0 %v1730_v25, %s1839_s1  ;;  %v1732_v29 = vpop.eup %1731 }
 0x8b6   :  { %v1734_v32 = vpop.eup %1733  ;;  %v615_v50 = vadd.f32 1.0, %v1732_v29 }
 0x8b7   :  { %v587_v33 = vadd.f32 1.0, %v1734_v32 }
 0x8b8   :  { %1735 = vrcp.f32 %v615_v50 }
 0x8b9   :  { %1737 = vrcp.f32 %v587_v33 }
 0x8c2   :  { %v1736_v35 = vpop.eup %1735 }
 0x8c3   :  { %v1738_v37 = vpop.eup %1737  ;;  %v619_v43 = vmul.f32 %v1736_v35, %v497_v4 }
 0x8c4   :  { %v591_v45 = vmul.f32 %v1738_v37, %v465_v7 }
 0x926   :  { %v622_v36 = vpop.permute.xlu1 %621 }
 0x927   :  { %v624_v38 = vmul.f32 %v1736_v35, %v622_v36  ;;  %v594_v39 = vpop.permute.xlu0 %593 }
 0x928   :  { %v596_v41 = vmul.f32 %v1738_v37, %v594_v39 }
 0x929   :  { %626 = vrot.lane.b32.xlu1 %v624_v38, %s1839_s1 }
 0x92a   :  { %598 = vrot.lane.b32.xlu0 %v596_v41, %s1839_s1 }
 0x99b   :  { %v627_v44 = vpop.permute.xlu1 %626 }
 0x99c   :  { %v629_v48 = vadd.f32 %v627_v44, %v619_v43  ;;  %v599_v49 = vpop.permute.xlu0 %598  ;;  %v161_v43 = vadd.f32 %v2028_v52, %v1901_v5 }
 0x99d   :  { %v601_v56 = vadd.f32 %v599_v49, %v591_v45 }
 0x99e   :  { %1739 = vtanh.f32 %v629_v48 }
 0x99f   :  { %1741 = vtanh.f32 %v601_v56 }
 0x9a8   :  { %v1740_v51 = vpop.eup %1739 }
 0x9a9   :  { %v1742_v57 = vpop.eup %1741  ;;  %632 = vrot.lane.b32.xlu1 %v1740_v51, %s1839_s1 }
 0x9aa   :  { %604 = vrot.lane.b32.xlu0 %v1742_v57, %s1839_s1 }
 0xa1b   :  { %v633_v58 = vpop.permute.xlu1 %632 }
 0xa1c   :  { %v635_v60 = vmul.f32 %v1736_v35, %v633_v58  ;;  %v605_v61 = vpop.permute.xlu0 %604 }
 0xa1d   :  { %v2113_v62 = vmul.f32 %v1738_v37, %v605_v61 }
 0xa1e   :  { %637 = vrot.lane.b32.xlu0 %v635_v60, %s1840_s30 }
 0xa1f   :  { %641 = vrot.lane.b32.xlu1 %v2113_v62, %s1842_s4 }
 0xa90   :  { %v638_v63 = vpop.permute.xlu0 %637 }
 0xa91   :  { %v642_v0 = vpop.permute.xlu1 %641 }
 0xa92   :  { %v644_v1 = vsel %vm228_vm1, %v638_v63, %v642_v0 }
 0xa93   :  { %1442 = vmatmul.mubr.msk.f32.vlgmr.msra.gmra.mrb[12].mxu0 %vm230_vm2, %v644_v1 }
 0xa94   :  { %1605 = vmatpush1.bf16.msra.mxu0 %v1933_v23  ;;  %989 = vmatprep.mubr.f32.mxu0 %v1841_v47 }
 0xa95   :  { %1607 = vmatprep.subr.bf16.mxu0 %v1947_v27 }
 0xa98   :  { %1609 = vmatpush1.bf16.msra.mxu0 %v1956_v30 }
 0xa99   :  { %1611 = vmatprep.subr.bf16.mxu0 %v1969_v34 }
 0xa9c   :  { %1613 = vmatpush1.bf16.msra.mxu0 %v1991_v40 }
 0xa9d   :  { %1615 = vmatprep.subr.bf16.mxu0 %v1998_v42 }
 0xaa0   :  { %1617 = vmatpush1.bf16.msra.mxu0 %v2010_v46 }
 0xaa1   :  { %1635 = vmatprep.subr.bf16.mxu0 %v1922_v19 }
 0xb66   :  { %v714_v3 = vpop.f32.mrb[12].mxu0 }
 0xb67   :  { %v751_v4 = vadd.f32 %v714_v3, %v156_v2  ;;  %v716_v6 = vpop.f32.mrb[13].mxu0 }
 0xb68   :  { %v719_v7 = vadd.f32 %v2052_v59, %v716_v6 }
 0xb69   :  { %1743 = vtanh.f32 %v751_v4  ;;  %v1444_v10 = vmul.f32 -1.442695, %v751_v4 }
 0xb6a   :  { %1745 = vtanh.f32 %v719_v7  ;;  %v1443_v11 = vmul.f32 -1.442695, %v719_v7 }
 0xb6b   :  { %1747 = vpow2.f32 %v1444_v10 }
 0xb6c   :  { %1749 = vpow2.f32 %v1443_v11 }
 0xb73   :  { %v1744_v8 = vpop.eup %1743 }
 0xb74   :  { %v1746_v9 = vpop.eup %1745  ;;  %761 = vrot.lane.b32.xlu1 %v1744_v8, %s1839_s1 }
 0xb75   :  { %729 = vrot.lane.b32.xlu0 %v1746_v9, %s1839_s1  ;;  %v1748_v19 = vpop.eup %1747 }
 0xb76   :  { %v1750_v12 = vpop.eup %1749  ;;  %v755_v53 = vadd.f32 1.0, %v1748_v19 }
 0xb77   :  { %v723_v13 = vadd.f32 1.0, %v1750_v12 }
 0xb78   :  { %1751 = vrcp.f32 %v755_v53 }
 0xb79   :  { %1753 = vrcp.f32 %v723_v13 }
 0xb82   :  { %v1752_v14 = vpop.eup %1751 }
 0xb83   :  { %v1754_v17 = vpop.eup %1753  ;;  %v759_v22 = vmul.f32 %v1752_v14, %v629_v48 }
 0xb84   :  { %v727_v25 = vmul.f32 %v1754_v17, %v601_v56 }
 0xbe6   :  { %v762_v16 = vpop.permute.xlu1 %761 }
 0xbe7   :  { %v764_v18 = vmul.f32 %v1752_v14, %v762_v16  ;;  %v730_v20 = vpop.permute.xlu0 %729 }
 0xbe8   :  { %v732_v21 = vmul.f32 %v1754_v17, %v730_v20 }
 0xbe9   :  { %766 = vrot.lane.b32.xlu1 %v764_v18, %s1839_s1 }
 0xbea   :  { %734 = vrot.lane.b32.xlu0 %v732_v21, %s1839_s1 }
 0xc5b   :  { %v767_v24 = vpop.permute.xlu1 %766 }
 0xc5c   :  { %v769_v26 = vadd.f32 %v767_v24, %v759_v22  ;;  %v735_v28 = vpop.permute.xlu0 %734  ;;  %v166_v22 = vadd.f32 %v1901_v5, %v2034_v55 }
 0xc5d   :  { %v737_v29 = vadd.f32 %v735_v28, %v727_v25 }
 0xc5e   :  { %1755 = vtanh.f32 %v769_v26 }
 0xc5f   :  { %1757 = vtanh.f32 %v737_v29 }
 0xc68   :  { %v1756_v32 = vpop.eup %1755 }
 0xc69   :  { %v1758_v50 = vpop.eup %1757  ;;  %772 = vrot.lane.b32.xlu1 %v1756_v32, %s1839_s1 }
 0xc6a   :  { %740 = vrot.lane.b32.xlu0 %v1758_v50, %s1839_s1 }
 0xcdb   :  { %v773_v33 = vpop.permute.xlu1 %772 }
 0xcdc   :  { %v775_v35 = vmul.f32 %v1752_v14, %v773_v33  ;;  %v741_v36 = vpop.permute.xlu0 %740 }
 0xcdd   :  { %v2138_v37 = vmul.f32 %v1754_v17, %v741_v36 }
 0xcde   :  { %777 = vrot.lane.b32.xlu0 %v775_v35, %s1840_s30 }
 0xcdf   :  { %780 = vrot.lane.b32.xlu1 %v2138_v37, %s1842_s4 }
 0xd50   :  { %v778_v38 = vpop.permute.xlu0 %777 }
 0xd51   :  { %v781_v39 = vpop.permute.xlu1 %780 }
 0xd52   :  { %v783_v41 = vsel %vm228_vm1, %v778_v38, %v781_v39 }
 0xd53   :  { %1445 = vmatmul.mubr.msk.f32.vlgmr.msra.gmra.mrb[2].mxu1 %vm230_vm2, %v783_v41 }
 0xd54   :  { %1621 = vmatpush1.bf16.msra.mxu1 %v1933_v23  ;;  %1124 = vmatprep.mubr.f32.mxu1 %v1841_v47 }
 0xd55   :  { %1623 = vmatprep.subr.bf16.mxu1 %v1947_v27 }
 0xd58   :  { %1625 = vmatpush1.bf16.msra.mxu1 %v1956_v30 }
 0xd59   :  { %1627 = vmatprep.subr.bf16.mxu1 %v1969_v34 }
 0xd5c   :  { %1629 = vmatpush1.bf16.msra.mxu1 %v1991_v40 }
 0xd5d   :  { %1631 = vmatprep.subr.bf16.mxu1 %v1998_v42 }
 0xd60   :  { %1633 = vmatpush1.bf16.msra.mxu1 %v2010_v46 }
 0xe26   :  { %v853_v44 = vpop.f32.mrb[2].mxu1 }
 0xe27   :  { %v889_v45 = vadd.f32 %v853_v44, %v161_v43  ;;  %v855_v48 = vpop.f32.mrb[3].mxu1 }
 0xe28   :  { %v858_v49 = vadd.f32 %v2052_v59, %v855_v48 }
 0xe29   :  { %1759 = vtanh.f32 %v889_v45  ;;  %v1447_v57 = vmul.f32 -1.442695, %v889_v45 }
 0xe2a   :  { %1761 = vtanh.f32 %v858_v49  ;;  %v1446_v58 = vmul.f32 -1.442695, %v858_v49 }
 0xe2b   :  { %1763 = vpow2.f32 %v1447_v57 }
 0xe2c   :  { %1765 = vpow2.f32 %v1446_v58 }
 0xe33   :  { %v1760_v56 = vpop.eup %1759 }
 0xe34   :  { %v1762_v51 = vpop.eup %1761  ;;  %899 = vrot.lane.b32.xlu1 %v1760_v56, %s1839_s1 }
 0xe35   :  { %868 = vrot.lane.b32.xlu0 %v1762_v51, %s1839_s1  ;;  %v1764_v60 = vpop.eup %1763 }
 0xe36   :  { %v1766_v61 = vpop.eup %1765  ;;  %v893_v52 = vadd.f32 1.0, %v1764_v60 }
 0xe37   :  { %v862_v63 = vadd.f32 1.0, %v1766_v61 }
 0xe38   :  { %1767 = vrcp.f32 %v893_v52  ;;  %v171_v52 = vadd.f32 %v2032_v54, %v1901_v5 }
 0xe39   :  { %1769 = vrcp.f32 %v862_v63 }
 0xe42   :  { %v1768_v0 = vpop.eup %1767 }
 0xe43   :  { %v1770_v2 = vpop.eup %1769  ;;  %v897_v7 = vmul.f32 %v1768_v0, %v769_v26 }
 0xe44   :  { %v866_v9 = vmul.f32 %v1770_v2, %v737_v29 }
 0xea6   :  { %v900_v1 = vpop.permute.xlu1 %899 }
 0xea7   :  { %v902_v3 = vmul.f32 %v1768_v0, %v900_v1  ;;  %v869_v4 = vpop.permute.xlu0 %868 }
 0xea8   :  { %v871_v6 = vmul.f32 %v1770_v2, %v869_v4 }
 0xea9   :  { %904 = vrot.lane.b32.xlu1 %v902_v3, %s1839_s1 }
 0xeaa   :  { %873 = vrot.lane.b32.xlu0 %v871_v6, %s1839_s1 }
 0xf1b   :  { %v905_v8 = vpop.permute.xlu1 %904 }
 0xf1c   :  { %v907_v10 = vadd.f32 %v905_v8, %v897_v7  ;;  %v874_v11 = vpop.permute.xlu0 %873 }
 0xf1d   :  { %v876_v19 = vadd.f32 %v874_v11, %v866_v9 }
 0xf1e   :  { %1771 = vtanh.f32 %v907_v10 }
 0xf1f   :  { %1773 = vtanh.f32 %v876_v19 }
 0xf28   :  { %v1772_v12 = vpop.eup %1771 }
 0xf29   :  { %v1774_v53 = vpop.eup %1773  ;;  %910 = vrot.lane.b32.xlu1 %v1772_v12, %s1839_s1 }
 0xf2a   :  { %879 = vrot.lane.b32.xlu0 %v1774_v53, %s1839_s1 }
 0xf9b   :  { %v911_v13 = vpop.permute.xlu1 %910 }
 0xf9c   :  { %v913_v14 = vmul.f32 %v1768_v0, %v911_v13  ;;  %v880_v16 = vpop.permute.xlu0 %879 }
 0xf9d   :  { %v2162_v17 = vmul.f32 %v1770_v2, %v880_v16 }
 0xf9e   :  { %915 = vrot.lane.b32.xlu0 %v913_v14, %s1840_s30 }
 0xf9f   :  { %918 = vrot.lane.b32.xlu1 %v2162_v17, %s1842_s4 }
0x1010   :  { %v916_v18 = vpop.permute.xlu0 %915 }
0x1011   :  { %v919_v20 = vpop.permute.xlu1 %918 }
0x1012   :  { %v921_v21 = vsel %vm228_vm1, %v916_v18, %v919_v20 }
0x1013   :  { %1448 = vmatmul.mubr.msk.f32.vlgmr.msra.gmra.mrb[14].mxu0 %vm230_vm2, %v921_v21 }
0x1014   :  { %1637 = vmatpush1.bf16.msra.mxu0 %v1933_v23  ;;  %1259 = vmatprep.mubr.f32.mxu0 %v1841_v47 }
0x1015   :  { %1639 = vmatprep.subr.bf16.mxu0 %v1947_v27 }
0x1018   :  { %1641 = vmatpush1.bf16.msra.mxu0 %v1956_v30 }
0x1019   :  { %1643 = vmatprep.subr.bf16.mxu0 %v1969_v34 }
0x101c   :  { %1645 = vmatpush1.bf16.msra.mxu0 %v1991_v40 }
0x101d   :  { %1647 = vmatprep.subr.bf16.mxu0 %v1998_v42 }
0x1020   :  { %1649 = vmatpush1.bf16.msra.mxu0 %v2010_v46 }
0x10e6   :  { %v991_v24 = vpop.f32.mrb[14].mxu0 }
0x10e7   :  { %v1027_v25 = vadd.f32 %v991_v24, %v166_v22  ;;  %v993_v23 = vpop.f32.mrb[15].mxu0 }
0x10e8   :  { %v996_v47 = vadd.f32 %v2052_v59, %v993_v23 }
0x10e9   :  { %1775 = vtanh.f32 %v1027_v25  ;;  %v1450_v34 = vmul.f32 -1.442695, %v1027_v25 }
0x10ea   :  { %1777 = vtanh.f32 %v996_v47  ;;  %v1449_v40 = vmul.f32 -1.442695, %v996_v47 }
0x10eb   :  { %1779 = vpow2.f32 %v1450_v34 }
0x10ec   :  { %1781 = vpow2.f32 %v1449_v40 }
0x10f3   :  { %v1776_v27 = vpop.eup %1775 }
0x10f4   :  { %v1778_v30 = vpop.eup %1777  ;;  %1037 = vrot.lane.b32.xlu1 %v1776_v27, %s1839_s1 }
0x10f5   :  { %1006 = vrot.lane.b32.xlu0 %v1778_v30, %s1839_s1  ;;  %v1780_v42 = vpop.eup %1779 }
0x10f6   :  { %v1782_v46 = vpop.eup %1781  ;;  %v1031_v55 = vadd.f32 1.0, %v1780_v42 }
0x10f7   :  { %v1000_v26 = vadd.f32 1.0, %v1782_v46 }
0x10f8   :  { %1783 = vrcp.f32 %v1031_v55 }
0x10f9   :  { %1785 = vrcp.f32 %v1000_v26 }
0x1102   :  { %v1784_v28 = vpop.eup %1783 }
0x1103   :  { %v1786_v32 = vpop.eup %1785  ;;  %v1035_v36 = vmul.f32 %v1784_v28, %v907_v10 }
0x1104   :  { %v1004_v39 = vmul.f32 %v1786_v32, %v876_v19 }
0x1166   :  { %v1038_v29 = vpop.permute.xlu1 %1037 }
0x1167   :  { %v1040_v50 = vmul.f32 %v1784_v28, %v1038_v29  ;;  %v1007_v33 = vpop.permute.xlu0 %1006 }
0x1168   :  { %v1009_v35 = vmul.f32 %v1786_v32, %v1007_v33 }
0x1169   :  { %1042 = vrot.lane.b32.xlu1 %v1040_v50, %s1839_s1 }
0x116a   :  { %1011 = vrot.lane.b32.xlu0 %v1009_v35, %s1839_s1 }
0x11db   :  { %v1043_v38 = vpop.permute.xlu1 %1042 }
0x11dc   :  { %v1045_v41 = vadd.f32 %v1043_v38, %v1035_v36  ;;  %v1012_v43 = vpop.permute.xlu0 %1011 }
0x11dd   :  { %v1014_v44 = vadd.f32 %v1012_v43, %v1004_v39  ;;  %v1313_v43 = vld [vmem:[%s2347_s5 + $0x80] sm:$0xff] }
0x11de   :  { %1787 = vtanh.f32 %v1045_v41 }
0x11df   :  { %1789 = vtanh.f32 %v1014_v44 }
0x11e8   :  { %v1788_v45 = vpop.eup %1787 }
0x11e9   :  { %v1790_v48 = vpop.eup %1789  ;;  %1048 = vrot.lane.b32.xlu1 %v1788_v45, %s1839_s1 }
0x11ea   :  { %1017 = vrot.lane.b32.xlu0 %v1790_v48, %s1839_s1  ;;  %v1298_v48 = vld [vmem:[%s2347_s5 + $0x8] sm:$0xff] }
0x125b   :  { %v1049_v49 = vpop.permute.xlu1 %1048 }
0x125c   :  { %v1051_v56 = vmul.f32 %v1784_v28, %v1049_v49  ;;  %v1018_v51 = vpop.permute.xlu0 %1017  ;;  %v1315_v49 = vld [vmem:[%s2347_s5 + $0x90] sm:$0xff] }
0x125d   :  { %v1020_v57 = vmul.f32 %v1786_v32, %v1018_v51 }
0x125e   :  { %1053 = vrot.lane.b32.xlu1 %v1051_v56, %s1840_s30  ;;  %v1316_v56 = vld [vmem:[%s2347_s5 + $0x98] sm:$0xff] }
0x125f   :  { %1022 = vrot.lane.b32.xlu0 %v1020_v57, %s1842_s4  ;;  %v1654_v57 = vpack.c.bf16 %v1316_v56, %v1315_v49 }
0x12d0   :  { %v1054_v58 = vpop.permute.xlu1 %1053 }
0x12d1   :  { %v2188_v60 = vpop.permute.xlu0 %1022 }
0x12d2   :  { %v1056_v61 = vsel %vm228_vm1, %v1054_v58, %v2188_v60  ;;  %v1299_v58 = vld [vmem:[%s2347_s5 + $0x10] sm:$0xff] }
0x12d3   :  { %1451 = vmatmul.mubr.msk.f32.vlgmr.msra.gmra.mrb[4].mxu1 %vm230_vm2, %v1056_v61  ;;  %v1317_v61 = vld [vmem:[%s2347_s5 + $0xa0] sm:$0xff] }
0x13a6   :  { %v1126_v63 = vpop.f32.mrb[4].mxu1 }
0x13a7   :  { %v1158_v0 = vadd.f32 %v1126_v63, %v171_v52  ;;  %v1128_v1 = vpop.f32.mrb[5].mxu1  ;;  %v1318_v52 = vld [vmem:[%s2347_s5 + $0xa8] sm:$0xff] }
0x13a8   :  { %v1131_v2 = vadd.f32 %v2052_v59, %v1128_v1  ;;  %v1658_v1 = vpack.c.bf16 %v1318_v52, %v1317_v61 }
0x13a9   :  { %1791 = vtanh.f32 %v1158_v0  ;;  %v1453_v6 = vmul.f32 -1.442695, %v1158_v0 }
0x13aa   :  { %1793 = vtanh.f32 %v1131_v2  ;;  %v1452_v7 = vmul.f32 -1.442695, %v1131_v2  ;;  %v1301_v2 = vld [vmem:[%s2347_s5 + $0x20] sm:$0xff] }
0x13ab   :  { %1795 = vpow2.f32 %v1453_v6  ;;  %v1320_v6 = vld [vmem:[%s2347_s5 + $0xb8] sm:$0xff] }
0x13ac   :  { %1797 = vpow2.f32 %v1452_v7 }
0x13b3   :  { %v1792_v3 = vpop.eup %1791 }
0x13b4   :  { %v1794_v4 = vpop.eup %1793  ;;  %1168 = vrot.lane.b32.xlu1 %v1792_v3, %s1839_s1  ;;  %v1302_v3 = vld [vmem:[%s2347_s5 + $0x28] sm:$0xff] }
0x13b5   :  { %1141 = vrot.lane.b32.xlu0 %v1794_v4, %s1839_s1  ;;  %v1796_v8 = vpop.eup %1795  ;;  %v1319_v4 = vld [vmem:[%s2347_s5 + $0xb0] sm:$0xff]  ;;  %v1660_v7 = vpack.c.bf16 %v1302_v3, %v1301_v2 }
0x13b6   :  { %v1798_v9 = vpop.eup %1797  ;;  %v1162_v5 = vadd.f32 1.0, %v1796_v8  ;;  %v1662_v8 = vpack.c.bf16 %v1320_v6, %v1319_v4 }
0x13b7   :  { %v1135_v54 = vadd.f32 1.0, %v1798_v9  ;;  %v1303_v9 = vld [vmem:[%s2347_s5 + $0x30] sm:$0xff] }
0x13b8   :  { %1799 = vrcp.f32 %v1162_v5  ;;  %v1304_v5 = vld [vmem:[%s2347_s5 + $0x38] sm:$0xff] }
0x13b9   :  { %1801 = vrcp.f32 %v1135_v54  ;;  %v1321_v54 = vld [vmem:[%s2347_s5 + $0xc0] sm:$0xff] }
0x13c2   :  { %v1800_v10 = vpop.eup %1799 }
0x13c3   :  { %v1802_v19 = vpop.eup %1801  ;;  %v1166_v14 = vmul.f32 %v1800_v10, %v1045_v41 }
0x13c4   :  { %v1139_v18 = vmul.f32 %v1802_v19, %v1014_v44  ;;  %v1297_v44 = vld [vmem:[%s2347_s5] sm:$0xff] }
0x13c5   :  { %v1652_v51 = vpack.c.bf16 %v1298_v48, %v1297_v44 }
0x1426   :  { %v1169_v11 = vpop.permute.xlu1 %1168 }
0x1427   :  { %v1171_v12 = vmul.f32 %v1800_v10, %v1169_v11  ;;  %v1142_v53 = vpop.permute.xlu0 %1141 }
0x1428   :  { %v1144_v13 = vmul.f32 %v1802_v19, %v1142_v53  ;;  %v1323_v53 = vld [vmem:[%s2347_s5 + $0xd0] sm:$0xff] }
0x1429   :  { %1173 = vrot.lane.b32.xlu1 %v1171_v12, %s1839_s1  ;;  %v1306_v12 = vld [vmem:[%s2347_s5 + $0x48] sm:$0xff] }
0x142a   :  { %1146 = vrot.lane.b32.xlu0 %v1144_v13, %s1839_s1  ;;  %v1324_v13 = vld [vmem:[%s2347_s5 + $0xd8] sm:$0xff] }
0x149b   :  { %v1174_v16 = vpop.permute.xlu1 %1173 }
0x149c   :  { %v1176_v20 = vadd.f32 %v1174_v16, %v1166_v14  ;;  %v1147_v21 = vpop.permute.xlu0 %1146  ;;  %v1670_v14 = vpack.c.bf16 %v1324_v13, %v1323_v53  ;;  %v1307_v16 = vld [vmem:[%s2347_s5 + $0x50] sm:$0xff] }
0x149d   :  { %v1149_v22 = vadd.f32 %v1147_v21, %v1139_v18  ;;  %v1308_v18 = vld [vmem:[%s2347_s5 + $0x58] sm:$0xff]  ;;  %v1325_v21 = vld [vmem:[%s2347_s5 + $0xe0] sm:$0xff] }
0x149e   :  { %1803 = vtanh.f32 %v1176_v20  ;;  %v1672_v20 = vpack.c.bf16 %v1308_v18, %v1307_v16 }
0x149f   :  { %1805 = vtanh.f32 %v1149_v22 }
0x14a8   :  { %v1804_v24 = vpop.eup %1803 }
0x14a9   :  { %v1806_v25 = vpop.eup %1805  ;;  %1179 = vrot.lane.b32.xlu1 %v1804_v24, %s1839_s1 }
0x14aa   :  { %1152 = vrot.lane.b32.xlu0 %v1806_v25, %s1839_s1  ;;  %v1309_v25 = vld [vmem:[%s2347_s5 + $0x60] sm:$0xff] }
0x151b   :  { %v1180_v23 = vpop.permute.xlu1 %1179 }
0x151c   :  { %v1182_v47 = vmul.f32 %v1800_v10, %v1180_v23  ;;  %v1153_v27 = vpop.permute.xlu0 %1152  ;;  %v1322_v10 = vld [vmem:[%s2347_s5 + $0xc8] sm:$0xff] }
0x151d   :  { %v1155_v30 = vmul.f32 %v1802_v19, %v1153_v27  ;;  %v1666_v11 = vpack.c.bf16 %v1322_v10, %v1321_v54  ;;  %v1305_v19 = vld [vmem:[%s2347_s5 + $0x40] sm:$0xff]  ;;  %v1310_v23 = vld [vmem:[%s2347_s5 + $0x68] sm:$0xff]  ;;  %v1327_v27 = vld [vmem:[%s2347_s5 + $0xf0] sm:$0xff] }
0x151e   :  { %1184 = vrot.lane.b32.xlu0 %v1182_v47, %s1840_s30  ;;  %v1676_v47 = vpack.c.bf16 %v1310_v23, %v1309_v25 }
0x151f   :  { %1188 = vrot.lane.b32.xlu1 %v1155_v30, %s1842_s4 }
0x1590   :  { %v1185_v34 = vpop.permute.xlu0 %1184 }
0x1591   :  { %v1189_v40 = vpop.permute.xlu1 %1188 }
0x1592   :  { %v1191_v42 = vsel %vm228_vm1, %v1185_v34, %v1189_v40  ;;  %v1311_v34 = vld [vmem:[%s2347_s5 + $0x70] sm:$0xff] }
0x1593   :  { %1454 = vmatmul.mubr.msk.f32.vlgmr.msra.gmra.mrb[16].mxu0 %vm230_vm2, %v1191_v42  ;;  %v1312_v42 = vld [vmem:[%s2347_s5 + $0x78] sm:$0xff] }
0x1666   :  { %v1261_v46 = vpop.f32.mrb[16].mxu0 }
0x1667   :  { %v1262_v55 = vpop.f32.mrb[17].mxu0  ;;  %v1680_v46 = vpack.c.bf16 %v1312_v42, %v1311_v34 }
0x1668   :  { %v1265_v26 = vadd.f32 %v2052_v59, %v1262_v55 }
0x166a   :  { %1807 = vtanh.f32 %v1265_v26  ;;  %v1455_v29 = vmul.f32 -1.442695, %v1265_v26 }
0x166c   :  { %1809 = vpow2.f32 %v1455_v29 }
0x1674   :  { %v1808_v28 = vpop.eup %1807 }
0x1675   :  { %1275 = vrot.lane.b32.xlu0 %v1808_v28, %s1839_s1 }
0x1676   :  { %v1810_v32 = vpop.eup %1809 }
0x1677   :  { %v1269_v50 = vadd.f32 1.0, %v1810_v32 }
0x1679   :  { %1811 = vrcp.f32 %v1269_v50 }
0x1683   :  { %v2208_v33 = vpop.eup %1811 }
0x1684   :  { %v1273_v59 = vmul.f32 %v2208_v33, %v1149_v22  ;;  %v1326_v22 = vld [vmem:[%s2347_s5 + $0xe8] sm:$0xff] }
0x1685   :  { %v1674_v24 = vpack.c.bf16 %v1326_v22, %v1325_v21 }
0x16e7   :  { %v1276_v35 = vpop.permute.xlu0 %1275 }
0x16e8   :  { %v1278_v36 = vmul.f32 %v2208_v33, %v1276_v35 }
0x16ea   :  { %1280 = vrot.lane.b32.xlu1 %v1278_v36, %s1839_s1  ;;  %v1456_v36 = vld [vmem:[%s2348_s6] ss:$0 sm:$0xff] }
0x16ee   :  { %884 = vrot.lane.b32.xlu1 %v2162_v17, %s1840_s30  ;;  %v1314_v17 = vld [vmem:[%s2347_s5 + $0x88] sm:$0xff] }
0x16ef   :  { %v1650_v45 = vpack.c.bf16 %v1314_v17, %v1313_v43 }
0x16f1   :  { %1651 = vmatprep.subr.bf16.mxu1 %v1650_v45 }
0x16f2   :  { %1653 = vmatpush3.bf16.msra.mxu1 %v1652_v51 }
0x16f3   :  { %1655 = vmatprep.subr.bf16.mxu1 %v1654_v57 }
0x175c   :  { %v1281_v38 = vpop.permute.xlu1 %1280 }
0x175d   :  { %v1283_v39 = vadd.f32 %v1281_v38, %v1273_v59 }
0x175f   :  { %1813 = vtanh.f32 %v1283_v39 }
0x1760   :  { %v885_v41 = vpop.permute.xlu1 %884 }
0x1761   :  { %887 = vst.msk [vmem:[#allocation3 + $0x8] sm:$0xff] %vm228_vm1, %v885_v41 }
0x1762   :  { %1025 = vst.msk [vmem:[#allocation3 + $0x8] sm:$0xff] %vm476_vm3, %v2188_v60  ;;  %v1300_v60 = vld [vmem:[%s2347_s5 + $0x18] sm:$0xff] }
0x1763   :  { %1156 = vst.msk [vmem:[#allocation3 + $0x8] sm:$0xff] %vm608_vm4, %v1155_v30  ;;  %v1656_v0 = vpack.c.bf16 %v1300_v60, %v1299_v58  ;;  %v1328_v30 = vld [vmem:[%s2347_s5 + $0xf8] sm:$0xff] }
0x1764   :  { %v1678_v40 = vpack.c.bf16 %v1328_v30, %v1327_v27 }
0x1765   :  { %1657 = vmatpush3.bf16.msra.mxu1 %v1656_v0 }
0x1766   :  { %1659 = vmatprep.subr.bf16.mxu1 %v1658_v1 }
0x1769   :  { %v1814_v63 = vpop.eup %1813  ;;  %1661 = vmatpush3.bf16.msra.mxu1 %v1660_v7 }
0x176a   :  { %1286 = vrot.lane.b32.xlu0 %v1814_v63, %s1839_s1  ;;  %1663 = vmatprep.subr.bf16.mxu1 %v1662_v8 }
0x176e   :  { %331 = vrot.lane.b32.xlu0 %v2063_v31, %s1840_s30  ;;  %v1664_v31 = vpack.c.bf16 %v1304_v5, %v1303_v9 }
0x1770   :  { %1665 = vmatpush3.bf16.msra.mxu1 %v1664_v31 }
0x1771   :  { %1667 = vmatprep.subr.bf16.mxu1 %v1666_v11 }
0x1772   :  { %745 = vrot.lane.b32.xlu0 %v2138_v37, %s1839_s1  ;;  %v1668_v37 = vpack.c.bf16 %v1306_v12, %v1305_v19 }
0x1774   :  { %1669 = vmatpush3.bf16.msra.mxu1 %v1668_v37 }
0x1775   :  { %1671 = vmatprep.subr.bf16.mxu1 %v1670_v14 }
0x1778   :  { %1673 = vmatpush3.bf16.msra.mxu1 %v1672_v20 }
0x1779   :  { %1675 = vmatprep.subr.bf16.mxu1 %v1674_v24 }
0x177c   :  { %1677 = vmatpush3.bf16.msra.mxu1 %v1676_v47 }
0x177d   :  { %1679 = vmatprep.subr.bf16.mxu1 %v1678_v40 }
0x1780   :  { %1681 = vmatpush3.bf16.msra.mxu1 %v1680_v46 }
0x17dc   :  { %v1287_v55 = vpop.permute.xlu0 %1286 }
0x17dd   :  { %v1289_v26 = vmul.f32 %v2208_v33, %v1287_v55 }
0x17df   :  { %1291 = vrot.lane.b32.xlu1 %v1289_v26, %s1839_s1 }
0x17e0   :  { %v332_v28 = vpop.permute.xlu0 %331 }
0x17e1   :  { %334 = vst.msk [vmem:[#allocation3] sm:$0xff] %vm228_vm1, %v332_v28 }
0x17e2   :  { %477 = vst.msk [vmem:[#allocation3] sm:$0xff] %vm476_vm3, %v2090_v15 }
0x17e3   :  { %609 = vst.msk [vmem:[#allocation3] sm:$0xff] %vm608_vm4, %v2113_v62 }
0x17e4   :  { %v746_v29 = vpop.permute.xlu0 %745 }
0x17e5   :  { %749 = vst.msk [vmem:[#allocation3] sm:$0xff] %vm748_vm5, %v746_v29 }
0x17ec   :  { %v1295_v35 = vld [vmem:[#allocation3] sm:$0xff] }
0x1851   :  { %v1292_v32 = vpop.permute.xlu1 %1291 }
0x1852   :  { %1294 = vst.msk [vmem:[#allocation3 + $0x8] sm:$0xff] %vm748_vm5, %v1292_v32 }
0x1859   :  { %v1296_v50 = vld [vmem:[#allocation3 + $0x8] sm:$0xff] }
0x185a   :  { %1400 = vmatprep.mubr.f32.mxu1 %v1296_v50 }
0x185b   :  { %1401 = vmatmul.mubr.f32.vlgmr.msra.gmra.mrb[6].mxu1 %v1295_v35 }
0x192e   :  { %v1499_v33 = vpop.f32.mrb[6].mxu1 }
0x192f   :  { %v1500_v59 = vpop.f32.mrb[7].mxu1 }
0x1930   :  { %v1501_v15 = vadd.f32 %v1500_v59, %v1499_v33 }
0x1932   :  { %v1403_v38 = vadd.f32 %v1501_v15, %v1456_v36 }
0x1934   :  { %1407 = vst.msk [vmem:[#allocation4] sm:$0xff] %vm1406_vm6, %v1403_v38 }
0x1935   :  { %1826 = shalt.err (!%p1823_p4)
}
0x1936   :  { %s1827_s22 = scalar_lea.hbm %s2349_s7, 128 }
0x1937   :  { %p1828_p5 = scmp.ne.s32.totalorder %s2349_s7, %s1827_s22  ;;  %p1831_p6 = scmp.lt.u32.totalorder %s1827_s22, %s2349_s7 }
0x1939   :  { %p1833_p7 = pnand %p1831_p6, %p1828_p5 }
0x193b   :  { %1836 = shalt.err (!%p1833_p7)
}
0x193c   :  { %1417 = dma.vmem_to_hbm [thread:$0]  %s1415_s18, 128, %s2349_s7, [#allocation5]  }
0x193d   :  { %1837 = dma.done.wait [#allocation5], 128  }
0x193e   :  { %1838 = vsyncadd [#allocation5], 4294967168 }
0x193f   :  { %1421 = vsyncpa [#allocation5], 1 }

</bundles_post_ra>
